<compile_context>
chip_gen: v7x
topology: tpu7x:2x2x1
jax: 0.10.0
libtpu: 0.0.40
codegen_flags: <defaults>
</compile_context>

<pallas_src>
import math
import functools

import jax
import jax.numpy as jnp
from jax.experimental import pallas as pl
from jax.experimental.pallas import tpu as pltpu


def _layer_norm(t, gamma, beta, eps=1e-12):
    # f32 math throughout (eps=1e-12 is below bf16 resolution).
    mean = jnp.mean(t, axis=-1, keepdims=True)
    var = jnp.mean((t - mean) ** 2, axis=-1, keepdims=True)
    return gamma * ((t - mean) * jax.lax.rsqrt(var + eps)) + beta


def encoder_layer_kernel(
    x_ref, mask_ref,
    w_qkv_ref, b_qkv_ref, wc_ref, bc_ref,
    g1_ref, be1_ref,
    w1_ref, b1_ref, w2_ref, b2_ref,
    g2_ref, be2_ref,
    wo_ref, bo_ref,
    o_ref,
    q_sc, k_sc, v_sc,
    *, n_head, tq, exp_bf16,
):
    qi = pl.program_id(1)
    _, L, D = x_ref.shape
    dt = D // n_head
    bf = jnp.bfloat16

    # ---- fused QKV projection: once per batch, at the first query tile ----
    @pl.when(qi == 0)
    def _():
        xb = x_ref[0].astype(bf)                                          # (L, D)
        qkv = jnp.dot(xb, w_qkv_ref[...],
                      preferred_element_type=jnp.float32) + b_qkv_ref[...]  # (L, 3D)

        def heads(t):  # (L, D) f32 -> (H, L, dt) bf16 (head-major, cast before relayout)
            return t.astype(bf).reshape(L, n_head, dt).transpose(1, 0, 2)

        # 1/sqrt(dt) is already folded into the q columns of w_qkv / b_qkv.
        q_sc[...] = heads(qkv[:, 0:D])
        k_sc[...] = heads(qkv[:, D:2 * D])
        v_sc[...] = heads(qkv[:, 2 * D:3 * D])

    q_start = pl.multiple_of(qi * tq, tq)
    x_t = x_ref[0, pl.ds(q_start, tq), :]                                 # (tq, D) f32 residual
    mask_t = mask_ref[0]                                                  # (tq, 1); masks QUERY rows

    q4 = q_sc[:, pl.ds(q_start, tq), :]                                   # (H, tq, dt) bf16
    k4 = k_sc[...]                                                        # (H, L, dt)  bf16
    v4 = v_sc[...]                                                        # (H, L, dt)  bf16

    # ---- attention over the full key range (exact softmax, score tile bounded) ----
    score = jnp.einsum("hqd,hkd->hqk", q4, k4,
                       preferred_element_type=jnp.float32)                # (H, tq, L) f32
    score = jnp.where(mask_t[None, :, :] == 0, -10000.0, score)           # query-row mask
    score = score - jnp.max(score, axis=-1, keepdims=True)
    if exp_bf16:
        # v6e/v7x: native bf16 EUP/VPU -> halve data through the single EUP slot.
        p = jnp.exp(score.astype(bf))                                     # (H, tq, L) bf16
        l = jnp.sum(p.astype(jnp.float32), axis=-1, keepdims=True)        # (H, tq, 1) f32
    else:
        # v5e/v4: no bf16 VPU/EUP -> keep f32, cast only for the PV matmul.
        pf = jnp.exp(score)
        l = jnp.sum(pf, axis=-1, keepdims=True)
        p = pf.astype(bf)

    ctx = jnp.einsum("hqk,hkd->hqd", p, v4,
                     preferred_element_type=jnp.float32)                  # (H, tq, dt) f32
    # Normalize AFTER PV: O(H*tq*dt) multiply instead of O(H*tq*L) on the score.
    ctx = ctx * pl.reciprocal(l, approx=True)

    attn = ctx.transpose(1, 0, 2).reshape(tq, D)                          # concat heads
    attn = jnp.dot(attn.astype(bf), wc_ref[...],
                   preferred_element_type=jnp.float32) + bc_ref[...]

    # ---- dropout1 (identity, eval) + residual + norm1 (f32) ----
    x1 = _layer_norm(attn + x_t, g1_ref[...], be1_ref[...])

    # ---- PositionwiseFeedForward ----
    h = jnp.dot(x1.astype(bf), w1_ref[...],
                preferred_element_type=jnp.float32) + b1_ref[...]
    h = jnp.maximum(h, 0.0)
    ff = jnp.dot(h.astype(bf), w2_ref[...],
                 preferred_element_type=jnp.float32) + b2_ref[...]

    # ---- dropout2 (identity) + residual + norm2 (f32) ----
    x2 = _layer_norm(ff + x1, g2_ref[...], be2_ref[...])

    # ---- final linear (output padded to 128-lane multiple -> lane-dense store) ----
    o_ref[0] = jnp.dot(x2.astype(bf), wo_ref[...],
                       preferred_element_type=jnp.float32) + bo_ref[...]


def _pick_query_tile(L):
    # Bound the live (H, tq, L) score tile; keep tq a multiple of 8 (sublane rule).
    if L <= 256:
        return L
    for t in (256, 128, 64, 32, 16, 8):
        if L % t == 0:
            return t
    return L  # odd L: single tile fallback


def _use_bf16_exp():
    # bf16 EUP/VPU exist on v6e/v7x but not on v5e/v4: bf16 exp there only adds converts.
    try:
        kind = jax.devices()[0].device_kind.lower()
    except Exception:
        return True
    return not any(v in kind for v in ("v2", "v3", "v4", "v5"))


def _vmem_limit_bytes():
    # ~3/4 of physical VMEM (96 MiB on v5e/v6e, 48 MiB on v7x) instead of the
    # 16/32 MiB scoped default.
    try:
        cap = pltpu.get_tpu_info().vmem_capacity_bytes
    except Exception:
        return None
    return int(cap * 3 // 4)


def prepare_params(params, n_head):
    """One-time weight preprocessing: scale fold, QKV fusion, bf16 casts, lane padding.

    Hoisted out of encoder_layer so the per-call cost is just the kernel itself.
    """
    bf = jnp.bfloat16
    D = params["wq"].shape[0]
    OUT = params["wo"].shape[1]
    OUT_P = ((OUT + 127) // 128) * 128
    dt = D // n_head
    scale = 1.0 / math.sqrt(dt)

    # Fused QKV weight (D, 3D) with 1/sqrt(dt) folded into the q columns.
    w_qkv = jnp.concatenate(
        [params["wq"] * scale, params["wk"], params["wv"]], axis=1).astype(bf)
    b_qkv = jnp.concatenate(
        [params["bq"] * scale, params["bk"], params["bv"]], axis=1).astype(jnp.float32)

    # Final projection padded to a multiple of 128 lanes (zeros sliced off outside).
    wo_p = jnp.zeros((D, OUT_P), jnp.float32).at[:, :OUT].set(params["wo"]).astype(bf)
    bo_p = jnp.zeros((1, OUT_P), jnp.float32).at[:, :OUT].set(params["bo"])

    flat = [
        w_qkv, b_qkv,
        params["wc"].astype(bf), params["bc"],
        params["g1"], params["be1"],
        params["w1"].astype(bf), params["b1"],
        params["w2"].astype(bf), params["b2"],
        params["g2"], params["be2"],
        wo_p, bo_p,
    ]
    return {"flat": [jnp.asarray(a) for a in flat],
            "n_head": n_head, "out": OUT, "out_p": OUT_P, "d_model": D}


def encoder_layer(x, src_mask, prepped):
    B, L, D = x.shape
    n_head = prepped["n_head"]
    OUT, OUT_P = prepped["out"], prepped["out_p"]
    dt = D // n_head
    flat = prepped["flat"]

    tq = _pick_query_tile(L)
    n_q = max(L // tq, 1)

    mask3 = src_mask.reshape(B, L, 1).astype(jnp.float32)

    def weight_spec(a):
        nd = a.ndim
        # Grid-invariant block: single-buffer it (no re-DMA, half the resident VMEM).
        return pl.BlockSpec(a.shape, lambda b, qi, _nd=nd: (0,) * _nd,
                            pipeline_mode=pl.Buffered(buffer_count=1))

    in_specs = [
        pl.BlockSpec((1, L, D), lambda b, qi: (b, 0, 0)),   # full x per batch (K/V + residual)
        pl.BlockSpec((1, tq, 1), lambda b, qi: (b, qi, 0)),  # query-row mask tile
    ] + [weight_spec(a) for a in flat]

    kernel = functools.partial(
        encoder_layer_kernel, n_head=n_head, tq=tq, exp_bf16=_use_bf16_exp())

    out = pl.pallas_call(
        kernel,
        out_shape=jax.ShapeDtypeStruct((B, L, OUT_P), jnp.float32),
        grid=(B, n_q),
        in_specs=in_specs,
        out_specs=pl.BlockSpec((1, tq, OUT_P), lambda b, qi: (b, qi, 0)),
        scratch_shapes=[
            pltpu.VMEM((n_head, L, dt), jnp.bfloat16),   # q (head-major, per batch)
            pltpu.VMEM((n_head, L, dt), jnp.bfloat16),   # k
            pltpu.VMEM((n_head, L, dt), jnp.bfloat16),   # v
        ],
        compiler_params=pltpu.CompilerParams(
            # batch rows are independent (megacore); query-tile axis carries K/V scratch.
            dimension_semantics=("parallel", "arbitrary"),
            vmem_limit_bytes=_vmem_limit_bytes(),
        ),
    )(x, mask3, *flat)
    return out[..., :OUT]


def init_params(key, d_model, ffn_hidden, out, scale=0.05):
    ks = jax.random.split(key, 8)
    return {
        "wq": jax.random.normal(ks[0], (d_model, d_model), jnp.float32) * scale,
        "bq": jnp.zeros((1, d_model), jnp.float32),
        "wk": jax.random.normal(ks[1], (d_model, d_model), jnp.float32) * scale,
        "bk": jnp.zeros((1, d_model), jnp.float32),
        "wv": jax.random.normal(ks[2], (d_model, d_model), jnp.float32) * scale,
        "bv": jnp.zeros((1, d_model), jnp.float32),
        "wc": jax.random.normal(ks[3], (d_model, d_model), jnp.float32) * scale,
        "bc": jnp.zeros((1, d_model), jnp.float32),
        "g1": jnp.ones((1, d_model), jnp.float32),
        "be1": jnp.zeros((1, d_model), jnp.float32),
        "w1": jax.random.normal(ks[4], (d_model, ffn_hidden), jnp.float32) * scale,
        "b1": jnp.zeros((1, ffn_hidden), jnp.float32),
        "w2": jax.random.normal(ks[5], (ffn_hidden, d_model), jnp.float32) * scale,
        "b2": jnp.zeros((1, d_model), jnp.float32),
        "g2": jnp.ones((1, d_model), jnp.float32),
        "be2": jnp.zeros((1, d_model), jnp.float32),
        "wo": jax.random.normal(ks[6], (d_model, out), jnp.float32) * scale,
        "bo": jnp.zeros((1, out), jnp.float32),
    }


def reference(x, src_mask, p, n_head):
    # Pure-JAX f32 reference mirroring the PyTorch forward (eval-mode dropout).
    B, L, D = x.shape
    dt = D // n_head
    q = x @ p["wq"] + p["bq"]
    k = x @ p["wk"] + p["bk"]
    v = x @ p["wv"] + p["bv"]

    def split(t):
        return t.reshape(B, L, n_head, dt).transpose(0, 2, 1, 3)

    qh, kh, vh = split(q), split(k), split(v)
    score = jnp.einsum("bhqd,bhkd->bhqk", qh, kh) / math.sqrt(dt)
    m = src_mask.reshape(B, 1, L, 1)
    score = jnp.where(m == 0, -10000.0, score)
    score = jax.nn.softmax(score, axis=-1)
    o = jnp.einsum("bhqk,bhkd->bhqd", score, vh)
    o = o.transpose(0, 2, 1, 3).reshape(B, L, D)
    o = o @ p["wc"] + p["bc"]

    def ln(t, g, b, eps=1e-12):
        mean = t.mean(-1, keepdims=True)
        var = ((t - mean) ** 2).mean(-1, keepdims=True)
        return g * (t - mean) / jnp.sqrt(var + eps) + b

    x1 = ln(o + x, p["g1"], p["be1"])
    h = jnp.maximum(x1 @ p["w1"] + p["b1"], 0.0)
    ff = h @ p["w2"] + p["b2"]
    x2 = ln(ff + x1, p["g2"], p["be2"])
    return x2 @ p["wo"] + p["bo"]


if __name__ == "__main__":
    B, L, d_model, ffn_hidden, out, n_head = 2, 8, 32, 64, 16, 4

    key = jax.random.PRNGKey(0)
    kx, km, kp = jax.random.split(key, 3)
    x = jax.random.normal(kx, (B, L, d_model), jnp.float32)
    src_mask = (jax.random.uniform(km, (B, L)) > 0.25).astype(jnp.float32)
    params = init_params(kp, d_model, ffn_hidden, out)

    prepped = prepare_params(params, n_head)          # one-time weight preprocessing
    y = jax.block_until_ready(encoder_layer(x, src_mask, prepped))

    y_ref = reference(x, src_mask, params, n_head)
    assert y.shape == (B, L, out)
    # bf16 MXU inputs + (on v6e/v7x) bf16 exp + approx reciprocal -> compare against
    # the f32 reference at a tolerance consistent with bf16 precision.
    assert jnp.allclose(y, y_ref, atol=2.5e-2, rtol=2.5e-2), "mismatch vs reference"

    print("KERNEL_OK")
</pallas_src>

<mosaic_0001>
module attributes {stable_mosaic.version = 11 : i64} {
  func.func @encoder_layer_kernel(%arg0: i32, %arg1: i32, %arg2: memref<1x8x32xf32, #tpu.memory_space<vmem>>, %arg3: memref<1x8x1xf32, #tpu.memory_space<vmem>>, %arg4: memref<32x96xbf16, #tpu.memory_space<vmem>>, %arg5: memref<1x96xf32, #tpu.memory_space<vmem>>, %arg6: memref<32x32xbf16, #tpu.memory_space<vmem>>, %arg7: memref<1x32xf32, #tpu.memory_space<vmem>>, %arg8: memref<1x32xf32, #tpu.memory_space<vmem>>, %arg9: memref<1x32xf32, #tpu.memory_space<vmem>>, %arg10: memref<32x64xbf16, #tpu.memory_space<vmem>>, %arg11: memref<1x64xf32, #tpu.memory_space<vmem>>, %arg12: memref<64x32xbf16, #tpu.memory_space<vmem>>, %arg13: memref<1x32xf32, #tpu.memory_space<vmem>>, %arg14: memref<1x32xf32, #tpu.memory_space<vmem>>, %arg15: memref<1x32xf32, #tpu.memory_space<vmem>>, %arg16: memref<32x128xbf16, #tpu.memory_space<vmem>>, %arg17: memref<1x128xf32, #tpu.memory_space<vmem>>, %arg18: memref<1x8x128xf32, #tpu.memory_space<vmem>>, %arg19: memref<4x8x8xbf16, #tpu.memory_space<vmem>>, %arg20: memref<4x8x8xbf16, #tpu.memory_space<vmem>>, %arg21: memref<4x8x8xbf16, #tpu.memory_space<vmem>>) attributes {dimension_semantics = [#tpu.dimension_semantics<parallel>, #tpu.dimension_semantics<arbitrary>], iteration_bounds = array<i64: 2, 1>, scalar_prefetch = 0 : i64, scratch_operands = 3 : i64, tpu.core_type = #tpu.core_type<tc>, window_params = [{transform_indices = @transform_0, window_bounds = array<i64: 1, 8, 32>}, {transform_indices = @transform_1, window_bounds = array<i64: 1, 8, 1>}, {pipeline_mode = #tpu.pipeline_mode<synchronous>, transform_indices = @transform_2, window_bounds = array<i64: 32, 96>}, {pipeline_mode = #tpu.pipeline_mode<synchronous>, transform_indices = @transform_3, window_bounds = array<i64: 1, 96>}, {pipeline_mode = #tpu.pipeline_mode<synchronous>, transform_indices = @transform_4, window_bounds = array<i64: 32, 32>}, {pipeline_mode = #tpu.pipeline_mode<synchronous>, transform_indices = @transform_5, window_bounds = array<i64: 1, 32>}, {pipeline_mode = #tpu.pipeline_mode<synchronous>, transform_indices = @transform_6, window_bounds = array<i64: 1, 32>}, {pipeline_mode = #tpu.pipeline_mode<synchronous>, transform_indices = @transform_7, window_bounds = array<i64: 1, 32>}, {pipeline_mode = #tpu.pipeline_mode<synchronous>, transform_indices = @transform_8, window_bounds = array<i64: 32, 64>}, {pipeline_mode = #tpu.pipeline_mode<synchronous>, transform_indices = @transform_9, window_bounds = array<i64: 1, 64>}, {pipeline_mode = #tpu.pipeline_mode<synchronous>, transform_indices = @transform_10, window_bounds = array<i64: 64, 32>}, {pipeline_mode = #tpu.pipeline_mode<synchronous>, transform_indices = @transform_11, window_bounds = array<i64: 1, 32>}, {pipeline_mode = #tpu.pipeline_mode<synchronous>, transform_indices = @transform_12, window_bounds = array<i64: 1, 32>}, {pipeline_mode = #tpu.pipeline_mode<synchronous>, transform_indices = @transform_13, window_bounds = array<i64: 1, 32>}, {pipeline_mode = #tpu.pipeline_mode<synchronous>, transform_indices = @transform_14, window_bounds = array<i64: 32, 128>}, {pipeline_mode = #tpu.pipeline_mode<synchronous>, transform_indices = @transform_15, window_bounds = array<i64: 1, 128>}, {transform_indices = @transform_16, window_bounds = array<i64: 1, 8, 128>}]} {
    %c0_i32 = arith.constant 0 : i32
    %0 = arith.cmpi eq, %arg1, %c0_i32 : i32
    %1 = arith.extui %0 : i1 to i32
    %c0_i32_0 = arith.constant 0 : i32
    %2 = arith.cmpi ne, %1, %c0_i32_0 : i32
    scf.if %2 {
      %c0_60 = arith.constant 0 : index
      %c0_61 = arith.constant 0 : index
      %c0_62 = arith.constant 0 : index
      %116 = vector.load %arg2[%c0_60, %c0_61, %c0_62] : memref<1x8x32xf32, #tpu.memory_space<vmem>>, vector<1x8x32xf32>
      %117 = vector.shape_cast %116 : vector<1x8x32xf32> to vector<8x32xf32>
      %118 = arith.truncf %117 : vector<8x32xf32> to vector<8x32xbf16>
      %c0_63 = arith.constant 0 : index
      %c0_64 = arith.constant 0 : index
      %119 = vector.load %arg4[%c0_63, %c0_64] : memref<32x96xbf16, #tpu.memory_space<vmem>>, vector<32x96xbf16>
      %cst_65 = arith.constant dense<0.000000e+00> : vector<8x96xf32>
      %120 = tpu.matmul %118, %119, %cst_65 {dimension_numbers = #tpu.dot_dimension_numbers<[1], [0], [0], [1], [0, 0, 1, 1], [], []>} : vector<8x32xbf16>, vector<32x96xbf16>, vector<8x96xf32> -> vector<8x96xf32>
      %c0_66 = arith.constant 0 : index
      %c0_67 = arith.constant 0 : index
      %121 = vector.load %arg5[%c0_66, %c0_67] : memref<1x96xf32, #tpu.memory_space<vmem>>, vector<1x96xf32>
      %122 = vector.broadcast %121 : vector<1x96xf32> to vector<8x96xf32>
      %123 = arith.addf %120, %122 : vector<8x96xf32>
      %124 = vector.extract_strided_slice %123 {offsets = [0, 0], sizes = [8, 32], strides = [1, 1]} : vector<8x96xf32> to vector<8x32xf32>
      %125 = arith.truncf %124 : vector<8x32xf32> to vector<8x32xbf16>
      %126 = vector.shape_cast %125 : vector<8x32xbf16> to vector<8x4x8xbf16>
      %127 = tpu.transpose %126, [1, 0, 2] : vector<8x4x8xbf16> -> vector<4x8x8xbf16>
      %c0_68 = arith.constant 0 : index
      %c0_69 = arith.constant 0 : index
      %c0_70 = arith.constant 0 : index
      %128 = vector.load %arg19[%c0_68, %c0_69, %c0_70] : memref<4x8x8xbf16, #tpu.memory_space<vmem>>, vector<4x8x8xbf16>
      tpu.vector_store %arg19[%c0_68, %c0_69, %c0_70], %127 {strides = array<i32>} : memref<4x8x8xbf16, #tpu.memory_space<vmem>>, vector<4x8x8xbf16>,
      %129 = vector.extract_strided_slice %123 {offsets = [0, 32], sizes = [8, 32], strides = [1, 1]} : vector<8x96xf32> to vector<8x32xf32>
      %130 = arith.truncf %129 : vector<8x32xf32> to vector<8x32xbf16>
      %131 = vector.shape_cast %130 : vector<8x32xbf16> to vector<8x4x8xbf16>
      %132 = tpu.transpose %131, [1, 0, 2] : vector<8x4x8xbf16> -> vector<4x8x8xbf16>
      %c0_71 = arith.constant 0 : index
      %c0_72 = arith.constant 0 : index
      %c0_73 = arith.constant 0 : index
      %133 = vector.load %arg20[%c0_71, %c0_72, %c0_73] : memref<4x8x8xbf16, #tpu.memory_space<vmem>>, vector<4x8x8xbf16>
      tpu.vector_store %arg20[%c0_71, %c0_72, %c0_73], %132 {strides = array<i32>} : memref<4x8x8xbf16, #tpu.memory_space<vmem>>, vector<4x8x8xbf16>,
      %134 = vector.extract_strided_slice %123 {offsets = [0, 64], sizes = [8, 32], strides = [1, 1]} : vector<8x96xf32> to vector<8x32xf32>
      %135 = arith.truncf %134 : vector<8x32xf32> to vector<8x32xbf16>
      %136 = vector.shape_cast %135 : vector<8x32xbf16> to vector<8x4x8xbf16>
      %137 = tpu.transpose %136, [1, 0, 2] : vector<8x4x8xbf16> -> vector<4x8x8xbf16>
      %c0_74 = arith.constant 0 : index
      %c0_75 = arith.constant 0 : index
      %c0_76 = arith.constant 0 : index
      %138 = vector.load %arg21[%c0_74, %c0_75, %c0_76] : memref<4x8x8xbf16, #tpu.memory_space<vmem>>, vector<4x8x8xbf16>
      tpu.vector_store %arg21[%c0_74, %c0_75, %c0_76], %137 {strides = array<i32>} : memref<4x8x8xbf16, #tpu.memory_space<vmem>>, vector<4x8x8xbf16>,
    } else {
    }
    %c8_i32 = arith.constant 8 : i32
    %3 = arith.muli %arg1, %c8_i32 : i32
    %4 = tpu.assume_multiple %3, 8 : i32
    %c0 = arith.constant 0 : index
    %5 = arith.index_cast %4 : i32 to index
    %c0_1 = arith.constant 0 : index
    %6 = vector.load %arg2[%c0, %5, %c0_1] : memref<1x8x32xf32, #tpu.memory_space<vmem>>, vector<1x8x32xf32>
    %7 = vector.shape_cast %6 : vector<1x8x32xf32> to vector<8x32xf32>
    %c0_2 = arith.constant 0 : index
    %c0_3 = arith.constant 0 : index
    %c0_4 = arith.constant 0 : index
    %8 = vector.load %arg3[%c0_2, %c0_3, %c0_4] : memref<1x8x1xf32, #tpu.memory_space<vmem>>, vector<1x8x1xf32>
    %9 = vector.shape_cast %8 : vector<1x8x1xf32> to vector<8x1xf32>
    %c0_5 = arith.constant 0 : index
    %10 = arith.index_cast %4 : i32 to index
    %c0_6 = arith.constant 0 : index
    %11 = vector.load %arg19[%c0_5, %10, %c0_6] : memref<4x8x8xbf16, #tpu.memory_space<vmem>>, vector<4x8x8xbf16>
    %c0_7 = arith.constant 0 : index
    %c0_8 = arith.constant 0 : index
    %c0_9 = arith.constant 0 : index
    %12 = vector.load %arg20[%c0_7, %c0_8, %c0_9] : memref<4x8x8xbf16, #tpu.memory_space<vmem>>, vector<4x8x8xbf16>
    %c0_10 = arith.constant 0 : index
    %c0_11 = arith.constant 0 : index
    %c0_12 = arith.constant 0 : index
    %13 = vector.load %arg21[%c0_10, %c0_11, %c0_12] : memref<4x8x8xbf16, #tpu.memory_space<vmem>>, vector<4x8x8xbf16>
    "tpu.trace_start"() <{level = 10 : i32, message = "hqd,hkd->hqk"}> : () -> ()
    %cst = arith.constant dense<0.000000e+00> : vector<4x8x8xf32>
    %14 = tpu.matmul %11, %12, %cst {dimension_numbers = #tpu.dot_dimension_numbers<[2], [2], [1], [1], [0, 0, 0, 1, 1, 1], [0], [0]>} : vector<4x8x8xbf16>, vector<4x8x8xbf16>, vector<4x8x8xf32> -> vector<4x8x8xf32>
    "tpu.trace_stop"() : () -> ()
    %15 = vector.shape_cast %9 : vector<8x1xf32> to vector<1x8x1xf32>
    %cst_13 = arith.constant 0.000000e+00 : f32
    %16 = vector.broadcast %cst_13 : f32 to vector<1x8x1xf32>
    %17 = arith.cmpf oeq, %15, %16 : vector<1x8x1xf32>
    %cst_14 = arith.constant -1.000000e+04 : f32
    %18 = vector.shape_cast %17 : vector<1x8x1xi1> to vector<1x8x1xi1>
    %19 = vector.broadcast %18 : vector<1x8x1xi1> to vector<4x8x8xi1>
    %20 = vector.broadcast %cst_14 : f32 to vector<4x8x8xf32>
    %21 = arith.select %19, %20, %14 : vector<4x8x8xi1>, vector<4x8x8xf32>
    %cst_15 = arith.constant dense<0xFF800000> : vector<4x8xf32>
    %22 = vector.multi_reduction <maximumf>, %21, %cst_15 [2] : vector<4x8x8xf32> to vector<4x8xf32>
    %23 = vector.shape_cast %22 : vector<4x8xf32> to vector<4x8x1xf32>
    %24 = vector.broadcast %23 : vector<4x8x1xf32> to vector<4x8x8xf32>
    %25 = arith.subf %21, %24 : vector<4x8x8xf32>
    %26 = arith.truncf %25 : vector<4x8x8xf32> to vector<4x8x8xbf16>
    %27 = math.exp %26 : vector<4x8x8xbf16>
    %28 = arith.extf %27 : vector<4x8x8xbf16> to vector<4x8x8xf32>
    %cst_16 = arith.constant dense<0.000000e+00> : vector<4x8xf32>
    %29 = vector.multi_reduction <add>, %28, %cst_16 [2] : vector<4x8x8xf32> to vector<4x8xf32>
    %30 = vector.shape_cast %29 : vector<4x8xf32> to vector<4x8x1xf32>
    "tpu.trace_start"() <{level = 10 : i32, message = "hqk,hkd->hqd"}> : () -> ()
    %cst_17 = arith.constant dense<0.000000e+00> : vector<4x8x8xf32>
    %31 = tpu.matmul %27, %13, %cst_17 {dimension_numbers = #tpu.dot_dimension_numbers<[2], [1], [1], [2], [0, 0, 0, 1, 1, 2], [0], [0]>} : vector<4x8x8xbf16>, vector<4x8x8xbf16>, vector<4x8x8xf32> -> vector<4x8x8xf32>
    "tpu.trace_stop"() : () -> ()
    %32 = tpu.reciprocal %30 {approx = true} : vector<4x8x1xf32> -> vector<4x8x1xf32>
    %33 = vector.broadcast %32 : vector<4x8x1xf32> to vector<4x8x8xf32>
    %34 = arith.mulf %31, %33 : vector<4x8x8xf32>
    %35 = tpu.transpose %34, [1, 0, 2] : vector<4x8x8xf32> -> vector<8x4x8xf32>
    %36 = vector.shape_cast %35 : vector<8x4x8xf32> to vector<8x32xf32>
    %37 = arith.truncf %36 : vector<8x32xf32> to vector<8x32xbf16>
    %c0_18 = arith.constant 0 : index
    %c0_19 = arith.constant 0 : index
    %38 = vector.load %arg6[%c0_18, %c0_19] : memref<32x32xbf16, #tpu.memory_space<vmem>>, vector<32x32xbf16>
    %cst_20 = arith.constant dense<0.000000e+00> : vector<8x32xf32>
    %39 = tpu.matmul %37, %38, %cst_20 {dimension_numbers = #tpu.dot_dimension_numbers<[1], [0], [0], [1], [0, 0, 1, 1], [], []>} : vector<8x32xbf16>, vector<32x32xbf16>, vector<8x32xf32> -> vector<8x32xf32>
    %c0_21 = arith.constant 0 : index
    %c0_22 = arith.constant 0 : index
    %40 = vector.load %arg7[%c0_21, %c0_22] : memref<1x32xf32, #tpu.memory_space<vmem>>, vector<1x32xf32>
    %41 = vector.broadcast %40 : vector<1x32xf32> to vector<8x32xf32>
    %42 = arith.addf %39, %41 : vector<8x32xf32>
    %43 = arith.addf %42, %7 : vector<8x32xf32>
    %c0_23 = arith.constant 0 : index
    %c0_24 = arith.constant 0 : index
    %44 = vector.load %arg8[%c0_23, %c0_24] : memref<1x32xf32, #tpu.memory_space<vmem>>, vector<1x32xf32>
    %c0_25 = arith.constant 0 : index
    %c0_26 = arith.constant 0 : index
    %45 = vector.load %arg9[%c0_25, %c0_26] : memref<1x32xf32, #tpu.memory_space<vmem>>, vector<1x32xf32>
    %cst_27 = arith.constant dense<0.000000e+00> : vector<8xf32>
    %46 = vector.multi_reduction <add>, %43, %cst_27 [1] : vector<8x32xf32> to vector<8xf32>
    %47 = vector.shape_cast %46 : vector<8xf32> to vector<8x1xf32>
    %cst_28 = arith.constant 3.200000e+01 : f32
    %48 = vector.broadcast %cst_28 : f32 to vector<8x1xf32>
    %49 = arith.divf %47, %48 : vector<8x1xf32>
    %50 = vector.broadcast %49 : vector<8x1xf32> to vector<8x32xf32>
    %51 = arith.subf %43, %50 : vector<8x32xf32>
    %52 = arith.mulf %51, %51 : vector<8x32xf32>
    %cst_29 = arith.constant dense<0.000000e+00> : vector<8xf32>
    %53 = vector.multi_reduction <add>, %52, %cst_29 [1] : vector<8x32xf32> to vector<8xf32>
    %54 = vector.shape_cast %53 : vector<8xf32> to vector<8x1xf32>
    %cst_30 = arith.constant 3.200000e+01 : f32
    %55 = vector.broadcast %cst_30 : f32 to vector<8x1xf32>
    %56 = arith.divf %54, %55 : vector<8x1xf32>
    %57 = vector.broadcast %49 : vector<8x1xf32> to vector<8x32xf32>
    %58 = arith.subf %43, %57 : vector<8x32xf32>
    %cst_31 = arith.constant 9.99999996E-13 : f32
    %59 = vector.broadcast %cst_31 : f32 to vector<8x1xf32>
    %60 = arith.addf %56, %59 : vector<8x1xf32>
    %61 = math.rsqrt %60 : vector<8x1xf32>
    %62 = vector.broadcast %61 : vector<8x1xf32> to vector<8x32xf32>
    %63 = arith.mulf %58, %62 : vector<8x32xf32>
    %64 = vector.broadcast %44 : vector<1x32xf32> to vector<8x32xf32>
    %65 = arith.mulf %64, %63 : vector<8x32xf32>
    %66 = vector.broadcast %45 : vector<1x32xf32> to vector<8x32xf32>
    %67 = arith.addf %65, %66 : vector<8x32xf32>
    %68 = arith.truncf %67 : vector<8x32xf32> to vector<8x32xbf16>
    %c0_32 = arith.constant 0 : index
    %c0_33 = arith.constant 0 : index
    %69 = vector.load %arg10[%c0_32, %c0_33] : memref<32x64xbf16, #tpu.memory_space<vmem>>, vector<32x64xbf16>
    %cst_34 = arith.constant dense<0.000000e+00> : vector<8x64xf32>
    %70 = tpu.matmul %68, %69, %cst_34 {dimension_numbers = #tpu.dot_dimension_numbers<[1], [0], [0], [1], [0, 0, 1, 1], [], []>} : vector<8x32xbf16>, vector<32x64xbf16>, vector<8x64xf32> -> vector<8x64xf32>
    %c0_35 = arith.constant 0 : index
    %c0_36 = arith.constant 0 : index
    %71 = vector.load %arg11[%c0_35, %c0_36] : memref<1x64xf32, #tpu.memory_space<vmem>>, vector<1x64xf32>
    %72 = vector.broadcast %71 : vector<1x64xf32> to vector<8x64xf32>
    %73 = arith.addf %70, %72 : vector<8x64xf32>
    %cst_37 = arith.constant 0.000000e+00 : f32
    %74 = vector.broadcast %cst_37 : f32 to vector<8x64xf32>
    %75 = arith.maximumf %73, %74 : vector<8x64xf32>
    %76 = arith.truncf %75 : vector<8x64xf32> to vector<8x64xbf16>
    %c0_38 = arith.constant 0 : index
    %c0_39 = arith.constant 0 : index
    %77 = vector.load %arg12[%c0_38, %c0_39] : memref<64x32xbf16, #tpu.memory_space<vmem>>, vector<64x32xbf16>
    %cst_40 = arith.constant dense<0.000000e+00> : vector<8x32xf32>
    %78 = tpu.matmul %76, %77, %cst_40 {dimension_numbers = #tpu.dot_dimension_numbers<[1], [0], [0], [1], [0, 0, 1, 1], [], []>} : vector<8x64xbf16>, vector<64x32xbf16>, vector<8x32xf32> -> vector<8x32xf32>
    %c0_41 = arith.constant 0 : index
    %c0_42 = arith.constant 0 : index
    %79 = vector.load %arg13[%c0_41, %c0_42] : memref<1x32xf32, #tpu.memory_space<vmem>>, vector<1x32xf32>
    %80 = vector.broadcast %79 : vector<1x32xf32> to vector<8x32xf32>
    %81 = arith.addf %78, %80 : vector<8x32xf32>
    %82 = arith.addf %81, %67 : vector<8x32xf32>
    %c0_43 = arith.constant 0 : index
    %c0_44 = arith.constant 0 : index
    %83 = vector.load %arg14[%c0_43, %c0_44] : memref<1x32xf32, #tpu.memory_space<vmem>>, vector<1x32xf32>
    %c0_45 = arith.constant 0 : index
    %c0_46 = arith.constant 0 : index
    %84 = vector.load %arg15[%c0_45, %c0_46] : memref<1x32xf32, #tpu.memory_space<vmem>>, vector<1x32xf32>
    %cst_47 = arith.constant dense<0.000000e+00> : vector<8xf32>
    %85 = vector.multi_reduction <add>, %82, %cst_47 [1] : vector<8x32xf32> to vector<8xf32>
    %86 = vector.shape_cast %85 : vector<8xf32> to vector<8x1xf32>
    %cst_48 = arith.constant 3.200000e+01 : f32
    %87 = vector.broadcast %cst_48 : f32 to vector<8x1xf32>
    %88 = arith.divf %86, %87 : vector<8x1xf32>
    %89 = vector.broadcast %88 : vector<8x1xf32> to vector<8x32xf32>
    %90 = arith.subf %82, %89 : vector<8x32xf32>
    %91 = arith.mulf %90, %90 : vector<8x32xf32>
    %cst_49 = arith.constant dense<0.000000e+00> : vector<8xf32>
    %92 = vector.multi_reduction <add>, %91, %cst_49 [1] : vector<8x32xf32> to vector<8xf32>
    %93 = vector.shape_cast %92 : vector<8xf32> to vector<8x1xf32>
    %cst_50 = arith.constant 3.200000e+01 : f32
    %94 = vector.broadcast %cst_50 : f32 to vector<8x1xf32>
    %95 = arith.divf %93, %94 : vector<8x1xf32>
    %96 = vector.broadcast %88 : vector<8x1xf32> to vector<8x32xf32>
    %97 = arith.subf %82, %96 : vector<8x32xf32>
    %cst_51 = arith.constant 9.99999996E-13 : f32
    %98 = vector.broadcast %cst_51 : f32 to vector<8x1xf32>
    %99 = arith.addf %95, %98 : vector<8x1xf32>
    %100 = math.rsqrt %99 : vector<8x1xf32>
    %101 = vector.broadcast %100 : vector<8x1xf32> to vector<8x32xf32>
    %102 = arith.mulf %97, %101 : vector<8x32xf32>
    %103 = vector.broadcast %83 : vector<1x32xf32> to vector<8x32xf32>
    %104 = arith.mulf %103, %102 : vector<8x32xf32>
    %105 = vector.broadcast %84 : vector<1x32xf32> to vector<8x32xf32>
    %106 = arith.addf %104, %105 : vector<8x32xf32>
    %107 = arith.truncf %106 : vector<8x32xf32> to vector<8x32xbf16>
    %c0_52 = arith.constant 0 : index
    %c0_53 = arith.constant 0 : index
    %108 = vector.load %arg16[%c0_52, %c0_53] : memref<32x128xbf16, #tpu.memory_space<vmem>>, vector<32x128xbf16>
    %cst_54 = arith.constant dense<0.000000e+00> : vector<8x128xf32>
    %109 = tpu.matmul %107, %108, %cst_54 {dimension_numbers = #tpu.dot_dimension_numbers<[1], [0], [0], [1], [0, 0, 1, 1], [], []>} : vector<8x32xbf16>, vector<32x128xbf16>, vector<8x128xf32> -> vector<8x128xf32>
    %c0_55 = arith.constant 0 : index
    %c0_56 = arith.constant 0 : index
    %110 = vector.load %arg17[%c0_55, %c0_56] : memref<1x128xf32, #tpu.memory_space<vmem>>, vector<1x128xf32>
    %111 = vector.broadcast %110 : vector<1x128xf32> to vector<8x128xf32>
    %112 = arith.addf %109, %111 : vector<8x128xf32>
    %c0_57 = arith.constant 0 : index
    %c0_58 = arith.constant 0 : index
    %c0_59 = arith.constant 0 : index
    %113 = vector.load %arg18[%c0_57, %c0_58, %c0_59] : memref<1x8x128xf32, #tpu.memory_space<vmem>>, vector<1x8x128xf32>
    %114 = vector.shape_cast %113 : vector<1x8x128xf32> to vector<8x128xf32>
    %115 = vector.shape_cast %112 : vector<8x128xf32> to vector<1x8x128xf32>
    tpu.vector_store %arg18[%c0_57, %c0_58, %c0_59], %115 {strides = array<i32>} : memref<1x8x128xf32, #tpu.memory_space<vmem>>, vector<1x8x128xf32>,
    return
  }
  func.func @transform_0(%arg0: i32, %arg1: i32) -> (i32, i32, i32) {
    %c0_i32 = arith.constant 0 : i32
    %c0_i32_0 = arith.constant 0 : i32
    %c0_i32_1 = arith.constant 0 : i32
    return %arg0, %c0_i32, %c0_i32_0 : i32, i32, i32
  }
  func.func @transform_1(%arg0: i32, %arg1: i32) -> (i32, i32, i32) {
    %c0_i32 = arith.constant 0 : i32
    %c0_i32_0 = arith.constant 0 : i32
    return %arg0, %arg1, %c0_i32 : i32, i32, i32
  }
  func.func @transform_2(%arg0: i32, %arg1: i32) -> (i32, i32) {
    %c0_i32 = arith.constant 0 : i32
    %c0_i32_0 = arith.constant 0 : i32
    %c0_i32_1 = arith.constant 0 : i32
    return %c0_i32, %c0_i32_0 : i32, i32
  }
  func.func @transform_3(%arg0: i32, %arg1: i32) -> (i32, i32) {
    %c0_i32 = arith.constant 0 : i32
    %c0_i32_0 = arith.constant 0 : i32
    %c0_i32_1 = arith.constant 0 : i32
    return %c0_i32, %c0_i32_0 : i32, i32
  }
  func.func @transform_4(%arg0: i32, %arg1: i32) -> (i32, i32) {
    %c0_i32 = arith.constant 0 : i32
    %c0_i32_0 = arith.constant 0 : i32
    %c0_i32_1 = arith.constant 0 : i32
    return %c0_i32, %c0_i32_0 : i32, i32
  }
  func.func @transform_5(%arg0: i32, %arg1: i32) -> (i32, i32) {
    %c0_i32 = arith.constant 0 : i32
    %c0_i32_0 = arith.constant 0 : i32
    %c0_i32_1 = arith.constant 0 : i32
    return %c0_i32, %c0_i32_0 : i32, i32
  }
  func.func @transform_6(%arg0: i32, %arg1: i32) -> (i32, i32) {
    %c0_i32 = arith.constant 0 : i32
    %c0_i32_0 = arith.constant 0 : i32
    %c0_i32_1 = arith.constant 0 : i32
    return %c0_i32, %c0_i32_0 : i32, i32
  }
  func.func @transform_7(%arg0: i32, %arg1: i32) -> (i32, i32) {
    %c0_i32 = arith.constant 0 : i32
    %c0_i32_0 = arith.constant 0 : i32
    %c0_i32_1 = arith.constant 0 : i32
    return %c0_i32, %c0_i32_0 : i32, i32
  }
  func.func @transform_8(%arg0: i32, %arg1: i32) -> (i32, i32) {
    %c0_i32 = arith.constant 0 : i32
    %c0_i32_0 = arith.constant 0 : i32
    %c0_i32_1 = arith.constant 0 : i32
    return %c0_i32, %c0_i32_0 : i32, i32
  }
  func.func @transform_9(%arg0: i32, %arg1: i32) -> (i32, i32) {
    %c0_i32 = arith.constant 0 : i32
    %c0_i32_0 = arith.constant 0 : i32
    %c0_i32_1 = arith.constant 0 : i32
    return %c0_i32, %c0_i32_0 : i32, i32
  }
  func.func @transform_10(%arg0: i32, %arg1: i32) -> (i32, i32) {
    %c0_i32 = arith.constant 0 : i32
    %c0_i32_0 = arith.constant 0 : i32
    %c0_i32_1 = arith.constant 0 : i32
    return %c0_i32, %c0_i32_0 : i32, i32
  }
  func.func @transform_11(%arg0: i32, %arg1: i32) -> (i32, i32) {
    %c0_i32 = arith.constant 0 : i32
    %c0_i32_0 = arith.constant 0 : i32
    %c0_i32_1 = arith.constant 0 : i32
    return %c0_i32, %c0_i32_0 : i32, i32
  }
  func.func @transform_12(%arg0: i32, %arg1: i32) -> (i32, i32) {
    %c0_i32 = arith.constant 0 : i32
    %c0_i32_0 = arith.constant 0 : i32
    %c0_i32_1 = arith.constant 0 : i32
    return %c0_i32, %c0_i32_0 : i32, i32
  }
  func.func @transform_13(%arg0: i32, %arg1: i32) -> (i32, i32) {
    %c0_i32 = arith.constant 0 : i32
    %c0_i32_0 = arith.constant 0 : i32
    %c0_i32_1 = arith.constant 0 : i32
    return %c0_i32, %c0_i32_0 : i32, i32
  }
  func.func @transform_14(%arg0: i32, %arg1: i32) -> (i32, i32) {
    %c0_i32 = arith.constant 0 : i32
    %c0_i32_0 = arith.constant 0 : i32
    %c0_i32_1 = arith.constant 0 : i32
    return %c0_i32, %c0_i32_0 : i32, i32
  }
  func.func @transform_15(%arg0: i32, %arg1: i32) -> (i32, i32) {
    %c0_i32 = arith.constant 0 : i32
    %c0_i32_0 = arith.constant 0 : i32
    %c0_i32_1 = arith.constant 0 : i32
    return %c0_i32, %c0_i32_0 : i32, i32
  }
  func.func @transform_16(%arg0: i32, %arg1: i32) -> (i32, i32, i32) {
    %c0_i32 = arith.constant 0 : i32
    %c0_i32_0 = arith.constant 0 : i32
    return %arg0, %arg1, %c0_i32 : i32, i32, i32
  }
}

</mosaic_0001>

<bundles_post_ra>
// kernel: tpu_custom_call.1
= control target key start
LH: loop header
LB: loop body
LE: loop exit
PB: predicated region body
PF: predicated region fallthrough
CT: control target
= control target key end

     0   :  { %s3433_s0 = inlined_call_operand.vmem [shape: f32[2,8,32], index: 0, kind: input, shape index: {}]   ;;  %s3434_s1 = inlined_call_operand.vmem [shape: f32[2,8,1], index: 1, kind: input, shape index: {}]   ;;  %s3435_s2 = inlined_call_operand.vmem [shape: bf16[32,96], index: 2, kind: input, shape index: {}]   ;;  %s3436_s3 = inlined_call_operand.hbm [shape: f32[1,96], index: 3, kind: input, shape index: {}]   ;;  %s3437_s4 = inlined_call_operand.vmem [shape: bf16[32,32], index: 4, kind: input, shape index: {}]   ;;  %s3438_s5 = inlined_call_operand.hbm [shape: f32[1,32], index: 5, kind: input, shape index: {}]   ;;  %s3439_s6 = inlined_call_operand.hbm [shape: f32[1,32], index: 6, kind: input, shape index: {}]   ;;  %s3440_s7 = inlined_call_operand.hbm [shape: f32[1,32], index: 7, kind: input, shape index: {}]   ;;  %s3441_s8 = inlined_call_operand.vmem [shape: bf16[32,64], index: 8, kind: input, shape index: {}]   ;;  %s3442_s9 = inlined_call_operand.vmem [shape: f32[1,64], index: 9, kind: input, shape index: {}]   ;;  %s3443_s10 = inlined_call_operand.vmem [shape: bf16[64,32], index: 10, kind: input, shape index: {}]   ;;  %s3444_s11 = inlined_call_operand.vmem [shape: f32[1,32], index: 11, kind: input, shape index: {}]   ;;  %s3445_s12 = inlined_call_operand.vmem [shape: f32[1,32], index: 12, kind: input, shape index: {}]   ;;  %s3446_s13 = inlined_call_operand.vmem [shape: f32[1,32], index: 13, kind: input, shape index: {}]   ;;  %s3447_s14 = inlined_call_operand.vmem [shape: bf16[32,128], index: 14, kind: input, shape index: {}]   ;;  %s3448_s15 = inlined_call_operand.vmem [shape: f32[1,128], index: 15, kind: input, shape index: {}]   ;;  %s3449_s16 = inlined_call_operand.hbm [shape: f32[2,8,128], index: 16, kind: output, shape index: {}]  }
   0x1   :  { %3464 = sst [smem:[#allocation26_spill]] %s3433_s0 }
   0x2   :  { %3465 = sst [smem:[#allocation27_spill]] %s3438_s5 }
   0x3   :  { %3466 = sst [smem:[#allocation28_spill]] %s3446_s13 }
   0x4   :  { %3467 = sst [smem:[#allocation29_spill]] %s3448_s15 }
   0x5   :  { %3468 = sst [smem:[#allocation30_spill]] %s3449_s16 }
   0x6   :  { %21 = vsyncpa [#allocation6], 0 }
   0x7   :  { %22 = vsyncpa [#allocation9], 0 }
   0x8   :  { %23 = vsyncpa [#allocation12], 0 }
   0x9   :  { %24 = vsyncpa [#allocation7], 0 }
   0xa   :  { %26 = vsyncpa [#allocation7 + $0x1], 0  ;;  %s2950_s21 = smov 0   ;;  %s2952_s22 = smov 0  }
   0xb   :  { %s2954_s23 = smov 0   ;;  %s2956_s24 = smov 0  }
   0xc   :  { %s2958_s25 = smov 0   ;;  %s2960_s26 = smov 0  }
   0xd LB: > { %3469 = sst [smem:[#allocation18_spill]] %s2825_s21  ;;  %s2319_s27 = sadd.s32 4294967295, %s2845_s26   ;;  %s2845_s26 = sphi %s2960_s26, %s32_s26   ;;  %s2841_s25 = sphi %s2958_s25, %s3499_s25   ;;  %s2837_s24 = sphi %s2956_s24, %s3498_s24   ;;  %s2833_s23 = sphi %s2954_s23, %s3497_s23   ;;  %s2829_s22 = sphi %s2952_s22, %s3501_s22   ;;  %s2825_s21 = sphi %s2950_s21, %s3500_s21  }
   0xe   : > { %3470 = sst [smem:[#allocation19_spill]] %s2833_s23  ;;  %s2320_s28 = sadd.s32 4294967294, %s2845_s26  }
   0xf   : > { %3471 = sst [smem:[#allocation20_spill]] %s2841_s25  ;;  %s44_s29 = sadd.s32 1, %s2841_s25 }
  0x10   : > { %3472 = sst [smem:[#allocation21_spill]] %s2845_s26  ;;  %s401_s30 = sadd.s32 1, %s2833_s23 }
  0x11   : > { %p46_p0 = scmp.ge.s32.totalorder %s44_s29, 2  ;;  %p411_p1 = scmp.ne.s32.totalorder %s2833_s23, %s2829_s22 }
  0x12   : > { %p412_p2 = scmp.eq.s32.totalorder %s2319_s27, 1  ;;  %p417_p3 = scmp.ne.s32.totalorder %s2829_s22, %s2825_s21 }
  0x13   : > { %s3503_s29 = smov (%p46_p0, %s44_s29), 0  ;;  %p418_p5 = scmp.eq.s32.totalorder %s2320_s28, 1 }
  0x14   : > { %3473 = sst [smem:[#allocation22_spill]] %s3503_s29  ;;  %p2990_p4 = por %p412_p2, %p411_p1 }
  0x15   : > { %s396_s17 = ssub.s32 %s2841_s25, %s3503_s29  ;;  %p2321_p6 = scmp.ge.s32.totalorder %s2845_s26, 1 }
  0x16   : > { %s3474_s0 = scalar_select %p2990_p4, 1, 0 }
  0x17   : > { %p399_p7 = scmp.eq.s32.totalorder %s396_s17, 0  ;;  %p2997_p8 = por %p418_p5, %p417_p3 }
  0x18   : > { %3475 = sst [smem:[#allocation23_spill]] %s3474_s0  ;;  %p425_p9 = scmp.lt.s32.totalorder %s2845_s26, 3 }
  0x19   : > { %s3476_s18 = scalar_select %p2997_p8, 1, 0 }
  0x1a   : > { %s3003_s19 = scalar_select %p399_p7, %s2833_s23, %s401_s30  }
  0x1b   : > { %3477 = sst [smem:[#allocation24_spill]] %s3476_s18  ;;  %p3005_p10 = pnand %p2321_p6, %p425_p9 }
  0x1c   : > { %3478 = sst [smem:[#allocation25_spill]] %s3003_s19  ;;  %p3009_p11 = scmp.eq.s32.totalorder %s2319_s27, 0 }
  0x1d   : > { %s3479_s20 = scalar_select %p3005_p10, 1, 0 }
  0x1e   : > { %s3480_s21 = scalar_select %p3009_p11, 1, 0 }
  0x1f   : > { %p2518_p12 = pneg %p3005_p10  ;;  %s2847_s28 = smov [#allocation8]  }
  0x20   : > { %s455_s17 = sshll.u32 %s2847_s28, 4  ;;  %s2848_s30 = smov [#allocation5]   ;;  %s456_s17 = int_to_ptr.vmem [resolvable:$true] %s455_s17 }
  0x21   : > { %p3017_p13 = pnand %p3009_p11, %p2518_p12  ;;  %s441_s25 = sshll.u32 %s2848_s30, 4  ;;  %s3021_s25 = int_to_ptr.vmem [resolvable:$true] %s441_s25 }
  0x22   : > { %s3482_s5 = sld [smem:[#allocation27_spill]] }
  0x23   : > { %p3031_p1 = pneg %p3017_p13 }
  0x28   : > { %s2643_s23 = scalar_lea.hbm %s3482_s5, 16 }
  0x29   : > { %p2644_p0 = scmp.ne.s32.totalorder %s3482_s5, %s2643_s23  ;;  %p2650_p5 = scmp.lt.u32.totalorder %s2643_s23, %s3482_s5 }
  0x2b   : > { %p2646_p2 = pnand %p3031_p1, %p2644_p0 }
  0x2d   : > { %p2647_p3 = pneg %p2646_p2 }
  0x2f   : > { %p2652_p6 = pnand %p2650_p5, %p2647_p3 }
  0x31   : > { %2655 = shalt.err (!%p2652_p6)
}
  0x32   : > { %s2656_s19 = scalar_lea.vmem %s456_s17, 16  ;;  %s2663_s26 = scalar_lea.vmem %s456_s17, 32 }
  0x33   : > { %p2657_p7 = scmp.ne.s32.totalorder %s456_s17, %s2656_s19  ;;  %p2664_p8 = scmp.lt.s32.totalorder %s456_s17, %s456_s17 }
  0x34   : > { %p2665_p4 = scmp.lt.s32.totalorder %s2663_s26, %s2656_s19 }
  0x35   : > { %p2659_p9 = pnand %p2657_p7, %p3031_p1 }
  0x36   : > { %p2666_p11 = por %p2665_p4, %p2664_p8 }
  0x37   : > { %p2660_p12 = pneg %p2659_p9 }
  0x39   : > { %p2667_p10 = pnand %p2666_p11, %p2660_p12 }
  0x3b   : > { %2670 = shalt.err (!%p2667_p10)
}
  0x3c   : > { %2524 = dma.hbm_to_vmem [thread:$0]  (!%p3017_p13), %s3482_s5, 16, %s456_s17, [#allocation9]  }
  0x3d   : > { %s2671_s30 = scalar_lea.hbm %s3436_s3, 16 }
  0x3e   : > { %p2672_p0 = scmp.ne.s32.totalorder %s3436_s3, %s2671_s30  ;;  %p2678_p8 = scmp.lt.u32.totalorder %s2671_s30, %s3436_s3 }
  0x40   : > { %p2674_p2 = pnand %p2672_p0, %p3031_p1 }
  0x42   : > { %p2675_p4 = pneg %p2674_p2 }
  0x44   : > { %p2680_p10 = pnand %p2678_p8, %p2675_p4 }
  0x46   : > { %2683 = shalt.err (!%p2680_p10)
}
  0x47   : > { %s2684_s17 = scalar_lea.vmem %s3021_s25, 16  ;;  %s2691_s15 = scalar_lea.vmem %s3021_s25, 32 }
  0x48   : > { %p2685_p11 = scmp.ne.s32.totalorder %s3021_s25, %s2684_s17  ;;  %p2692_p6 = scmp.lt.s32.totalorder %s3021_s25, %s3021_s25 }
  0x49   : > { %p2693_p7 = scmp.lt.s32.totalorder %s2691_s15, %s2684_s17 }
  0x4a   : > { %p2687_p3 = pnand %p2685_p11, %p3031_p1 }
  0x4b   : > { %p2694_p9 = por %p2693_p7, %p2692_p6 }
  0x4c   : > { %p2688_p5 = pneg %p2687_p3 }
  0x4e   : > { %p2695_p12 = pnand %p2694_p9, %p2688_p5 }
  0x50   : > { %2698 = shalt.err (!%p2695_p12)
}
  0x51   : > { %2521 = dma.hbm_to_vmem [thread:$0]  (!%p3017_p13), %s3436_s3, 16, %s3021_s25, [#allocation6]  }
  0x52   : > { %s2849_s27 = smov [#allocation10]   ;;  %s2850_s23 = smov [#allocation11]  }
  0x53   : > { %s466_s16 = sshll.u32 %s2849_s27, 4  ;;  %s477_s30 = sshll.u32 %s2850_s23, 4  ;;  %s467_s16 = int_to_ptr.vmem [resolvable:$true] %s466_s16  ;;  %s478_s30 = int_to_ptr.vmem [resolvable:$true] %s477_s30 }
  0x54   : > { %s2699_s17 = scalar_lea.hbm %s3439_s6, 16 }
  0x55   : > { %p2700_p0 = scmp.ne.s32.totalorder %s3439_s6, %s2699_s17  ;;  %p2706_p8 = scmp.lt.u32.totalorder %s2699_s17, %s3439_s6 }
  0x57   : > { %p2702_p2 = pnand %p2700_p0, %p3031_p1 }
  0x59   : > { %p2703_p4 = pneg %p2702_p2 }
  0x5b   : > { %p2708_p10 = pnand %p2706_p8, %p2703_p4 }
  0x5d   : > { %2711 = shalt.err (!%p2708_p10)
}
  0x5e   : > { %s2712_s25 = scalar_lea.vmem %s467_s16, 16  ;;  %s2719_s18 = scalar_lea.vmem %s467_s16, 32 }
  0x5f   : > { %p2713_p11 = scmp.ne.s32.totalorder %s467_s16, %s2712_s25  ;;  %p2720_p6 = scmp.lt.s32.totalorder %s467_s16, %s467_s16 }
  0x60   : > { %p2721_p7 = scmp.lt.s32.totalorder %s2719_s18, %s2712_s25 }
  0x61   : > { %p2715_p3 = pnand %p2713_p11, %p3031_p1 }
  0x62   : > { %p2722_p9 = por %p2721_p7, %p2720_p6 }
  0x63   : > { %p2716_p5 = pneg %p2715_p3 }
  0x65   : > { %p2723_p12 = pnand %p2722_p9, %p2716_p5 }
  0x67   : > { %2726 = shalt.err (!%p2723_p12)
}
  0x68   : > { %2527 = dma.hbm_to_vmem [thread:$0]  (!%p3017_p13), %s3439_s6, 16, %s467_s16, [#allocation9]  }
  0x69   : > { %s2727_s19 = scalar_lea.hbm %s3440_s7, 16 }
  0x6a   : > { %p2728_p0 = scmp.ne.s32.totalorder %s3440_s7, %s2727_s19  ;;  %p2734_p8 = scmp.lt.u32.totalorder %s2727_s19, %s3440_s7 }
  0x6c   : > { %p2730_p2 = pnand %p2728_p0, %p3031_p1 }
  0x6e   : > { %p2731_p4 = pneg %p2730_p2 }
  0x70   : > { %p2736_p10 = pnand %p2734_p8, %p2731_p4 }
  0x72   : > { %2739 = shalt.err (!%p2736_p10)
}
  0x73   : > { %s2740_s25 = scalar_lea.vmem %s478_s30, 16  ;;  %s2747_s16 = scalar_lea.vmem %s478_s30, 32 }
  0x74   : > { %p2741_p11 = scmp.ne.s32.totalorder %s478_s30, %s2740_s25  ;;  %p2748_p6 = scmp.lt.s32.totalorder %s478_s30, %s478_s30 }
  0x75   : > { %p2749_p7 = scmp.lt.s32.totalorder %s2747_s16, %s2740_s25 }
  0x76   : > { %p2743_p3 = pnand %p2741_p11, %p3031_p1 }
  0x77   : > { %p2750_p9 = por %p2749_p7, %p2748_p6 }
  0x78   : > { %p2744_p5 = pneg %p2743_p3 }
  0x7a   : > { %p2751_p12 = pnand %p2750_p9, %p2744_p5 }
  0x7c   : > { %2754 = shalt.err (!%p2751_p12)
}
  0x7d   : > { %2530 = dma.hbm_to_vmem [thread:$0]  (!%p3017_p13), %s3440_s7, 16, %s478_s30, [#allocation12]  }
  0x7e   : > { %p3484_p0 = scmp.ne.s32.totalorder %s3479_s20, 0 }
  0x7f   : > { %p3485_p2 = scmp.ne.s32.totalorder (!%p3484_p0), %s3480_s21, 0 }
  0x80   : > { %531 = sbr.rel (%p3484_p0) target bundleno = 2887 (0xb47), region = 84 }
  0x87   : > { %2808 = dma.done.wait (%p3485_p2), [#allocation6], 16  }
  0x88   : > { %2810 = vsyncadd (%p3485_p2), [#allocation6], 4294967280 }
  0x89   : > { %2812 = dma.done.wait (%p3485_p2), [#allocation9], 32  }
  0x8a   : > { %2814 = vsyncadd (%p3485_p2), [#allocation9], 4294967264 }
  0x8b   : > { %2816 = dma.done.wait (%p3485_p2), [#allocation12], 16  }
  0x8c   : > { %2818 = vsyncadd (%p3485_p2), [#allocation12], 4294967280  ;;  %p599_p13 = scmp.lt.s32.totalorder %s2837_s24, 1  ;;  %v2851_v0 = vmov 0.0   ;;  %vm2852_vm0 = vmmov 0   ;;  %s3486_s30 = sld [smem:[#allocation26_spill]]  ;;  %v695_v15 = vlaneseq }
  0x8d   : > { %2408 = vmatprep.subr.bf16.mxu0 %v2851_v0  ;;  %2412 = vmatprep.mubr.msk.bf16.mxu0 %vm2852_vm0, %v2851_v0  ;;  %v2611_v1 = vld [vmem:[%s3435_s2] sm:$0xff]   ;;  %v2612_v2 = vld [vmem:[%s3435_s2 + $0x8] sm:$0xff]   ;;  %vm640_vm1 = vcmask 261120   ;;  %v2853_v5 = vmov 0   ;;  %v2335_v6 = vld [vmem:[#allocation5] ss:$0 sm:$0xff] }
  0x8e   : > { %s3126_s29 = scalar_select %p599_p13, %s2837_s24, 1  ;;  %2416 = vmatprep.subr.bf16.mxu1 %v2851_v0  ;;  %2418 = vmatprep.mubr.msk.bf16.mxu1 %vm2852_vm0, %v2851_v0  ;;  %v2858_v13 = vmov 1983009808   ;;  %v2859_v16 = vmov 1934713408   ;;  %v696_v19 = vshrl.u32 %v695_v15, 7 }
  0x8f   : > { %2409 = vmatpush3.bf16.msra.mxu0 %v2611_v1  ;;  %2609 = vset.pattern.permute.xlu1 %v2853_v5  ;;  %s2854_s17 = smov 104   ;;  %s2855_s15 = smov 120   ;;  %v693_v14 = vunpack.c.l.s4 %v2858_v13  ;;  %v710_v17 = vunpack.c.l.s4 %v2859_v16  ;;  %vm857_vm3 = vcmask 60416   ;;  %vm1238_vm4 = vcmask 64512  }
  0x90   : > { %s2333_s21 = sshll.u32 %s3126_s29, 3  ;;  %2410 = vmatprep.subr.bf16.mxu0 %v2851_v0  ;;  %2610 = vset.pattern.permute.xlu0 %v2853_v5  ;;  %s2856_s0 = smov 96   ;;  %vm1484_vm5 = vcmask 1043456   ;;  %vm1823_vm7 = vcmask 130048   ;;  %vm1825_vm8 = vcmask 195584   ;;  %vm2034_vm9 = vcmask 523264  }
  0x91   : > { %s2857_s25 = smov 112   ;;  %v694_v18 = vunpack.c.0.s8 %v693_v14  ;;  %v711_v20 = vunpack.c.0.s8 %v710_v17  ;;  %s609_s5 = scalar_lea.vmem %s3434_s1, %s2333_s21 }
  0x92   : > { %s602_s27 = scalar_lea.vmem %s3486_s30, %s2333_s21  ;;  %v1221_v27 = vld [vmem:[%s609_s5] sm:$0xff]  ;;  %s2860_s29 = smov 64  }
  0x93   : > { %v3143_v3 = vld [vmem:[%s602_s27] sm:$0xff]  ;;  %2411 = vmatpush3.bf16.msra.mxu0 %v2612_v2  ;;  %v3159_v21 = vsub.s32 %v694_v18, %v696_v19  ;;  %v3162_v25 = vsub.s32 %v711_v20, %v696_v19  ;;  %vm1423_vm2 = vcmp.eq.f32.partialorder %v1221_v27, 0.0  ;;  %s2861_s27 = smov 16   ;;  %s2862_s13 = smov 8  }
  0x94   : > { %v616_v4 = vpack.c.bf16 %v3143_v3, %v3143_v3  ;;  %2422 = vmatprep.subr.bf16.mxu0 %v2851_v0  ;;  %v1424_v35 = vsel %vm1423_vm2, 1, %v2853_v5  ;;  %s2863_s23 = smov 24   ;;  %s3487_s18 = sld [smem:[#allocation28_spill]] }
  0x95   : > { %s596_s5 = sand.u32 1, %s2829_s22   ;;  %s3488_s28 = sld [smem:[#allocation29_spill]] }
  0x96   : > { %2413 = vmatmul.mubr.msk.bf16.vlgmr.msra.gmra.mrb[0].mxu0 %vm640_vm1, %v616_v4  ;;  %s3489_s30 = sld [smem:[#allocation23_spill]] }
  0x97   : > { %2424 = vmatprep.mubr.msk.bf16.mxu0 %vm2852_vm0, %v2851_v0 }
  0x9c   : > { %p3491_p4 = scmp.ne.s32.totalorder %s3489_s30, 0 }
 0x169   : > { %v678_v7 = vpop.f32.mrb[0].mxu0 }
 0x16a   : > { %v679_v8 = vadd.f32 %v2335_v6, %v678_v7  ;;  %v2414_v9 = vpop.f32.mrb[1].mxu0 }
 0x16b   : > { %v681_v10 = vpop.f32.mrb[2].mxu0 }
 0x16c   : > { %v684_v11 = vpack.c.bf16 %v679_v8, %v679_v8  ;;  %v2415_v12 = vpop.f32.mrb[3].mxu0 }
 0x16e   : > { %690 = vrot.lane.b32.xlu1 %v684_v11, %s2854_s17  ;;  %686 = vrot.lane.b32.xlu0 %v684_v11, %s2855_s15  ;;  %v698_v33 = vrot.slane %v684_v11, %v3159_v21  ;;  %s3490_s17 = sld [smem:[#allocation30_spill]] }
 0x172   : > { %862 = vrot.lane.b32.xlu1 %v684_v11, %s2856_s0  ;;  %688 = vrot.lane.b32.xlu0 %v684_v11, %s2857_s25  ;;  %s2864_s25 = smov [#allocation13]  }
 0x173   : > { %s2759_s16 = sshll.u32 %s2864_s25, 4  ;;  %s2760_s16 = int_to_ptr.vmem [resolvable:$false] %s2759_s16 }
 0x1e0   : > { %v691_v22 = vpop.permute.xlu1 %690  ;;  %v687_v23 = vpop.permute.xlu0 %686 }
 0x1e1   : > { %v740_v24 = vrot.slane %v691_v22, %v3159_v21  ;;  %v732_v26 = vrot.slane %v687_v23, %v3159_v21  ;;  %864 = vrot.lane.b32.xlu0 %v687_v23, %s2856_s0 }
 0x1e3   : > { %v741_v28 = vcombine.low %v732_v26, %v740_v24  ;;  %v742_v29 = vcombine.high %v732_v26, %v740_v24 }
 0x1e4   : > { %v689_v30 = vpop.permute.xlu0 %688 }
 0x1e5   : > { %v749_v31 = vrot.slane %v741_v28, %v3162_v25  ;;  %v706_v32 = vrot.slane %v689_v30, %v3159_v21  ;;  %868 = vrot.lane.b32.xlu0 %v691_v22, %s2856_s0  ;;  %866 = vrot.lane.b32.xlu1 %v689_v30, %s2856_s0  ;;  %v756_v34 = vrot.slane %v742_v29, %v3162_v25  ;;  %s2177_s0 = scalar_lea.sflag [#allocation7], %s596_s5 }
 0x1e7   : > { %v707_v36 = vcombine.low %v698_v33, %v706_v32  ;;  %v708_v37 = vcombine.high %v698_v33, %v706_v32  ;;  %v757_v38 = vcombine.high %v749_v31, %v2853_v5  ;;  %v758_v41 = vcombine.high %v756_v34, %v2853_v5 }
 0x1e8   : > { %v764_v42 = vshrl.u32 %v749_v31, 16  ;;  %v780_v48 = vshrl.u32 %v756_v34, 16 }
 0x1e9   : > { %1040 = vrot.lane.b32.xlu0 %v684_v11, %s2860_s29  ;;  %v715_v39 = vrot.slane %v707_v36, %v3162_v25  ;;  %v722_v40 = vrot.slane %v708_v37, %v3162_v25  ;;  %1426 = vperm.xlu1 %2609, %v1424_v35   ;;  %v772_v47 = vshrl.u32 %v757_v38, 16  ;;  %v788_v55 = vshrl.u32 %v758_v41, 16 }
 0x1eb   : > { %v723_v43 = vcombine.high %v715_v39, %v2853_v5  ;;  %v724_v44 = vcombine.high %v722_v40, %v2853_v5  ;;  %v761_v45 = vpack.i.b16 %v749_v31, %v715_v39  ;;  %v763_v46 = vshrl.u32 %v715_v39, 16 }
 0x1ec   : > { %v777_v49 = vpack.i.b16 %v756_v34, %v722_v40  ;;  %v779_v50 = vshrl.u32 %v722_v40, 16 }
 0x1ed   : > { %1044 = vrot.lane.b32.xlu0 %v689_v30, %s2860_s29  ;;  %v765_v51 = vpack.i.b16 %v764_v42, %v763_v46  ;;  %v769_v52 = vpack.i.b16 %v757_v38, %v723_v43  ;;  %v771_v53 = vshrl.u32 %v723_v43, 16  ;;  %v785_v54 = vpack.i.b16 %v758_v41, %v724_v44  ;;  %1042 = vrot.lane.b32.xlu1 %v687_v23, %s2860_s29  ;;  %v863_v23 = vpop.permute.xlu1 %862 }
 0x1ee   : > { %v781_v56 = vpack.i.b16 %v780_v48, %v779_v50  ;;  %v787_v57 = vshrl.u32 %v724_v44, 16  ;;  %v791_v58 = vcombine.low %v761_v45, %v777_v49  ;;  %v877_v29 = vrot.slane %v863_v23, %v3159_v21 }
 0x1ef   : > { %v773_v59 = vpack.i.b16 %v772_v47, %v771_v53  ;;  %v799_v60 = vcombine.low %v769_v52, %v785_v54 }
 0x1f0   : > { %v789_v61 = vpack.i.b16 %v788_v55, %v787_v57  ;;  %v816_v62 = vcombine.low %v765_v51, %v781_v56  ;;  %v798_v63 = vrot.slane %v791_v58, %v3159_v21 }
 0x1f1   : > { %v806_v1 = vrot.slane %v799_v60, %v3159_v21  ;;  %1046 = vrot.lane.b32.xlu1 %v691_v22, %s2860_s29  ;;  %s2332_s29 = sshll.u32 %s596_s5, 3 }
 0x1f2   : > { %v824_v2 = vcombine.low %v773_v59, %v789_v61  ;;  %v823_v6 = vrot.slane %v816_v62, %v3159_v21 }
 0x1f3   : > { %v807_v4 = vcombine.low %v798_v63, %v806_v1 }
 0x1f4   : > { %v831_v7 = vrot.slane %v824_v2, %v3159_v21 }
 0x1f5   : > { %v814_v8 = vrot.slane %v807_v4, %v3162_v25 }
 0x1f6   : > { %v832_v9 = vcombine.low %v823_v6, %v831_v7 }
 0x1f7   : > { %v815_v10 = vcombine.high %v814_v8, %v2853_v5  ;;  %v845_v14 = vshrl.u32 %v814_v8, 16 }
 0x1f8   : > { %v839_v11 = vrot.slane %v832_v9, %v3162_v25 }
 0x1f9   : > { %v853_v18 = vshrl.u32 %v815_v10, 16 }
 0x1fa   : > { %v840_v12 = vcombine.high %v839_v11, %v2853_v5  ;;  %v843_v13 = vpack.i.b16 %v839_v11, %v814_v8  ;;  %v846_v15 = vshrl.u32 %v839_v11, 16 }
 0x1fc   : > { %v847_v16 = vpack.i.b16 %v846_v15, %v845_v14  ;;  %v851_v17 = vpack.i.b16 %v840_v12, %v815_v10  ;;  %v854_v19 = vshrl.u32 %v840_v12, 16  ;;  %858 = vst.msk [vmem:[#allocation2] sm:$0xf] %vm857_vm3, %v843_v13 }
 0x1fe   : > { %v855_v20 = vpack.i.b16 %v854_v19, %v853_v18  ;;  %859 = vst.msk [vmem:[#allocation2 + $0x4] sm:$0xf] %vm857_vm3, %v847_v16  ;;  %860 = vst.msk [vmem:[#allocation2 + $0x8] sm:$0xf] %vm857_vm3, %v851_v17 }
 0x200   : > { %861 = vst.msk [vmem:[#allocation2 + $0xc] sm:$0xf] %vm857_vm3, %v855_v20 }
 0x253   : > { %v865_v22 = vpop.permute.xlu0 %864 }
 0x254   : > { %v911_v26 = vrot.slane %v865_v22, %v3159_v21 }
 0x257   : > { %v869_v24 = vpop.permute.xlu0 %868  ;;  %v867_v27 = vpop.permute.xlu1 %866 }
 0x258   : > { %v919_v28 = vrot.slane %v869_v24, %v3159_v21  ;;  %v885_v30 = vrot.slane %v867_v27, %v3159_v21 }
 0x25a   : > { %v920_v31 = vcombine.low %v911_v26, %v919_v28  ;;  %v921_v32 = vcombine.high %v911_v26, %v919_v28  ;;  %v886_v33 = vcombine.low %v877_v29, %v885_v30  ;;  %v887_v34 = vcombine.high %v877_v29, %v885_v30 }
 0x25b   : > { %v1041_v47 = vpop.permute.xlu0 %1040 }
 0x25c   : > { %v928_v35 = vrot.slane %v920_v31, %v3162_v25  ;;  %v935_v36 = vrot.slane %v921_v32, %v3162_v25  ;;  %v894_v37 = vrot.slane %v886_v33, %v3162_v25  ;;  %v901_v38 = vrot.slane %v887_v34, %v3162_v25 }
 0x25d   : > { %v1055_v13 = vrot.slane %v1041_v47, %v3159_v21 }
 0x25e   : > { %v936_v39 = vcombine.high %v928_v35, %v2853_v5  ;;  %v937_v40 = vcombine.high %v935_v36, %v2853_v5  ;;  %v943_v41 = vshrl.u32 %v928_v35, 16  ;;  %v959_v42 = vshrl.u32 %v935_v36, 16 }
 0x25f   : > { %v902_v43 = vcombine.high %v894_v37, %v2853_v5  ;;  %v903_v44 = vcombine.high %v901_v38, %v2853_v5  ;;  %v942_v45 = vshrl.u32 %v894_v37, 16  ;;  %v958_v46 = vshrl.u32 %v901_v38, 16  ;;  %v1045_v1 = vpop.permute.xlu0 %1044 }
 0x260   : > { %v940_v48 = vpack.i.b16 %v928_v35, %v894_v37  ;;  %v951_v49 = vshrl.u32 %v936_v39, 16  ;;  %v956_v50 = vpack.i.b16 %v935_v36, %v901_v38  ;;  %v967_v51 = vshrl.u32 %v937_v40, 16 }
 0x261   : > { %v950_v52 = vshrl.u32 %v902_v43, 16  ;;  %v966_v53 = vshrl.u32 %v903_v44, 16  ;;  %v944_v54 = vpack.i.b16 %v943_v41, %v942_v45  ;;  %v948_v55 = vpack.i.b16 %v936_v39, %v902_v43 }
 0x262   : > { %v960_v56 = vpack.i.b16 %v959_v42, %v958_v46  ;;  %v964_v57 = vpack.i.b16 %v937_v40, %v903_v44  ;;  %v970_v58 = vcombine.low %v940_v48, %v956_v50  ;;  %v1063_v9 = vrot.slane %v1045_v1, %v3159_v21 }
 0x263   : > { %v952_v59 = vpack.i.b16 %v951_v49, %v950_v52  ;;  %v968_v60 = vpack.i.b16 %v967_v51, %v966_v53 }
 0x264   : > { %v978_v61 = vcombine.low %v948_v55, %v964_v57  ;;  %v995_v62 = vcombine.low %v944_v54, %v960_v56  ;;  %v977_v2 = vrot.slane %v970_v58, %v3159_v21  ;;  %v1064_v16 = vcombine.low %v1055_v13, %v1063_v9 }
 0x265   : > { %v1003_v63 = vcombine.low %v952_v59, %v968_v60  ;;  %v1065_v23 = vcombine.high %v1055_v13, %v1063_v9 }
 0x266   : > { %v985_v4 = vrot.slane %v978_v61, %v3159_v21  ;;  %v1002_v6 = vrot.slane %v995_v62, %v3159_v21  ;;  %v1072_v30 = vrot.slane %v1064_v16, %v3162_v25 }
 0x267   : > { %v1010_v7 = vrot.slane %v1003_v63, %v3159_v21  ;;  %v1079_v34 = vrot.slane %v1065_v23, %v3162_v25  ;;  %v1228_v23 = vld [vmem:[#allocation2 + $0x8] sm:$0xf] }
 0x268   : > { %v986_v8 = vcombine.low %v977_v2, %v985_v4  ;;  %v3209_v11 = vpop.permute.xlu1 %1426  ;;  %v1080_v37 = vcombine.high %v1072_v30, %v2853_v5  ;;  %v1120_v42 = vshrl.u32 %v1072_v30, 16 }
 0x269   : > { %v1011_v10 = vcombine.low %v1002_v6, %v1010_v7  ;;  %v1081_v41 = vcombine.high %v1079_v34, %v2853_v5  ;;  %v1136_v43 = vshrl.u32 %v1079_v34, 16  ;;  %vm1428_vm6 = vcmp.eq.s32.totalorder %v3209_v11, 1 }
 0x26a   : > { %v993_v12 = vrot.slane %v986_v8, %v3162_v25  ;;  %v1128_v50 = vshrl.u32 %v1080_v37, 16  ;;  %v1226_v8 = vld [vmem:[#allocation2] sm:$0xf] }
 0x26b   : > { %v1018_v14 = vrot.slane %v1011_v10, %v3162_v25  ;;  %v1144_v58 = vshrl.u32 %v1081_v41, 16 }
 0x26c   : > { %v994_v15 = vcombine.high %v993_v12, %v2853_v5  ;;  %v1024_v19 = vshrl.u32 %v993_v12, 16  ;;  %v1043_v22 = vpop.permute.xlu1 %1042 }
 0x26d   : > { %v1019_v17 = vcombine.high %v1018_v14, %v2853_v5  ;;  %v1022_v18 = vpack.i.b16 %v1018_v14, %v993_v12  ;;  %v1025_v20 = vshrl.u32 %v1018_v14, 16  ;;  %v1089_v32 = vrot.slane %v1043_v22, %v3159_v21  ;;  %v1227_v14 = vld [vmem:[#allocation2 + $0x4] sm:$0xf] }
 0x26e   : > { %v1032_v27 = vshrl.u32 %v994_v15, 16 }
 0x26f   : > { %v1026_v24 = vpack.i.b16 %v1025_v20, %v1024_v19  ;;  %v1030_v26 = vpack.i.b16 %v1019_v17, %v994_v15  ;;  %v1033_v28 = vshrl.u32 %v1019_v17, 16  ;;  %1036 = vst.msk [vmem:[#allocation3] sm:$0xf] %vm857_vm3, %v1022_v18 }
 0x270   : > { %v1047_v31 = vpop.permute.xlu1 %1046 }
 0x271   : > { %v1034_v29 = vpack.i.b16 %v1033_v28, %v1032_v27  ;;  %1037 = vst.msk [vmem:[#allocation3 + $0x4] sm:$0xf] %vm857_vm3, %v1026_v24  ;;  %1038 = vst.msk [vmem:[#allocation3 + $0x8] sm:$0xf] %vm857_vm3, %v1030_v26  ;;  %v1097_v33 = vrot.slane %v1047_v31, %v3159_v21 }
 0x273   : > { %1039 = vst.msk [vmem:[#allocation3 + $0xc] sm:$0xf] %vm857_vm3, %v1034_v29  ;;  %v1098_v35 = vcombine.low %v1089_v32, %v1097_v33  ;;  %v1099_v36 = vcombine.high %v1089_v32, %v1097_v33  ;;  %v1229_v29 = vld [vmem:[#allocation2 + $0xc] sm:$0xf] }
 0x275   : > { %v1106_v38 = vrot.slane %v1098_v35, %v3162_v25  ;;  %v1113_v39 = vrot.slane %v1099_v36, %v3162_v25 }
 0x276   : > { %v1230_v40 = vld [vmem:[#allocation3] sm:$0xf] }
 0x277   : > { %v1243_v44 = vsel %vm1238_vm4, %v1230_v40, 0  ;;  %v1114_v45 = vcombine.high %v1106_v38, %v2853_v5  ;;  %v1115_v46 = vcombine.high %v1113_v39, %v2853_v5  ;;  %v1118_v47 = vpack.i.b16 %v1106_v38, %v1072_v30 }
 0x278   : > { %v1121_v48 = vshrl.u32 %v1106_v38, 16  ;;  %2417 = vmatpush3.bf16.xpose.msra.mxu1 %v1243_v44  ;;  %v1231_v49 = vld [vmem:[#allocation3 + $0x4] sm:$0xf]  ;;  %v1134_v51 = vpack.i.b16 %v1113_v39, %v1079_v34  ;;  %v1137_v52 = vshrl.u32 %v1113_v39, 16  ;;  %v1232_v1 = vld [vmem:[#allocation3 + $0x8] sm:$0xf] }
 0x279   : > { %v1289_v53 = vsel %vm1238_vm4, %v1231_v49, 0  ;;  %2428 = vmatprep.subr.bf16.mxu1 %v2851_v0  ;;  %v1126_v55 = vpack.i.b16 %v1114_v45, %v1080_v37  ;;  %v1129_v56 = vshrl.u32 %v1114_v45, 16  ;;  %v1142_v57 = vpack.i.b16 %v1115_v46, %v1081_v41 }
 0x27a   : > { %v1122_v54 = vpack.i.b16 %v1121_v48, %v1120_v42  ;;  %2423 = vmatpush3.bf16.xpose.msra.mxu0 %v1289_v53  ;;  %v1138_v59 = vpack.i.b16 %v1137_v52, %v1136_v43  ;;  %v1145_v60 = vshrl.u32 %v1115_v46, 16  ;;  %v1148_v61 = vcombine.low %v1118_v47, %v1134_v51  ;;  %v1233_v9 = vld [vmem:[#allocation3 + $0xc] sm:$0xf] }
 0x27b   : > { %2434 = vmatprep.subr.bf16.mxu0 %v2851_v0  ;;  %v1130_v62 = vpack.i.b16 %v1129_v56, %v1128_v50  ;;  %v1156_v63 = vcombine.low %v1126_v55, %v1142_v57  ;;  %v1335_v12 = vsel %vm1238_vm4, %v1232_v1, 0  ;;  %v1381_v17 = vsel %vm1238_vm4, %v1233_v9, 0 }
 0x27c   : > { %v1146_v2 = vpack.i.b16 %v1145_v60, %v1144_v58  ;;  %v1173_v4 = vcombine.low %v1122_v54, %v1138_v59  ;;  %v1155_v6 = vrot.slane %v1148_v61, %v3159_v21 }
 0x27d   : > { %v1163_v7 = vrot.slane %v1156_v63, %v3159_v21 }
 0x27e   : > { %v1181_v10 = vcombine.low %v1130_v62, %v1146_v2  ;;  %v1180_v15 = vrot.slane %v1173_v4, %v3159_v21 }
 0x27f   : > { %2419 = vmatmul.mubr.msk.bf16.vlgmr.msra.gmra.mrb[0].mxu1 %vm1238_vm4, %v1226_v8  ;;  %v1164_v13 = vcombine.low %v1155_v6, %v1163_v7 }
 0x280   : > { %2429 = vmatpush3.bf16.xpose.msra.mxu1 %v1335_v12  ;;  %2430 = vmatprep.mubr.msk.bf16.mxu1 %vm2852_vm0, %v2851_v0  ;;  %v1188_v16 = vrot.slane %v1181_v10, %v3159_v21 }
 0x281   : > { %2425 = vmatmul.mubr.msk.bf16.vlgmr.msra.gmra.mrb[4].mxu0 %vm1238_vm4, %v1227_v14  ;;  %2440 = vmatprep.subr.bf16.mxu1 %v2851_v0  ;;  %v1171_v18 = vrot.slane %v1164_v13, %v3162_v25 }
 0x282   : > { %2435 = vmatpush3.bf16.xpose.msra.mxu0 %v1381_v17  ;;  %2436 = vmatprep.mubr.msk.bf16.mxu0 %vm2852_vm0, %v2851_v0  ;;  %v1189_v19 = vcombine.low %v1180_v15, %v1188_v16 }
 0x283   : > { %2446 = vmatprep.subr.bf16.mxu0 %v2851_v0  ;;  %v1172_v20 = vcombine.high %v1171_v18, %v2853_v5  ;;  %v1202_v27 = vshrl.u32 %v1171_v18, 16 }
 0x284   : > { %v1196_v22 = vrot.slane %v1189_v19, %v3162_v25 }
 0x285   : > { %v1210_v32 = vshrl.u32 %v1172_v20, 16 }
 0x286   : > { %v1197_v24 = vcombine.high %v1196_v22, %v2853_v5  ;;  %v1200_v26 = vpack.i.b16 %v1196_v22, %v1171_v18  ;;  %v1203_v28 = vshrl.u32 %v1196_v22, 16 }
 0x287   : > { %2431 = vmatmul.mubr.msk.bf16.vlgmr.msra.gmra.mrb[4].mxu1 %vm1238_vm4, %v1228_v23 }
 0x288   : > { %2442 = vmatprep.mubr.msk.bf16.mxu1 %vm2852_vm0, %v2851_v0  ;;  %v1204_v30 = vpack.i.b16 %v1203_v28, %v1202_v27  ;;  %v1208_v31 = vpack.i.b16 %v1197_v24, %v1172_v20  ;;  %v1211_v33 = vshrl.u32 %v1197_v24, 16  ;;  %1214 = vst.msk [vmem:[#allocation4] sm:$0xf] %vm857_vm3, %v1200_v26 }
 0x289   : > { %2437 = vmatmul.mubr.msk.bf16.vlgmr.msra.gmra.mrb[8].mxu0 %vm1238_vm4, %v1229_v29 }
 0x28a   : > { %2448 = vmatprep.mubr.msk.bf16.mxu0 %vm2852_vm0, %v2851_v0  ;;  %v1212_v5 = vpack.i.b16 %v1211_v33, %v1210_v32  ;;  %1215 = vst.msk [vmem:[#allocation4 + $0x4] sm:$0xf] %vm857_vm3, %v1204_v30  ;;  %1216 = vst.msk [vmem:[#allocation4 + $0x8] sm:$0xf] %vm857_vm3, %v1208_v31 }
 0x28c   : > { %1217 = vst.msk [vmem:[#allocation4 + $0xc] sm:$0xf] %vm857_vm3, %v1212_v5 }
 0x28f   : > { %v1234_v34 = vld [vmem:[#allocation4] sm:$0xf] }
 0x290   : > { %v1486_v35 = vsel %vm1484_vm5, %v1234_v34, 0 }
 0x291   : > { %2441 = vmatpush3.bf16.msra.mxu1 %v1486_v35  ;;  %v1235_v36 = vld [vmem:[#allocation4 + $0x4] sm:$0xf]  ;;  %v1236_v16 = vld [vmem:[#allocation4 + $0x8] sm:$0xf] }
 0x292   : > { %v1532_v37 = vsel %vm1484_vm5, %v1235_v36, 0  ;;  %2452 = vmatprep.subr.bf16.mxu1 %v2851_v0  ;;  %v1578_v20 = vsel %vm1484_vm5, %v1236_v16, 0 }
 0x293   : > { %2447 = vmatpush3.bf16.msra.mxu0 %v1532_v37  ;;  %v1237_v19 = vld [vmem:[#allocation4 + $0xc] sm:$0xf] }
 0x294   : > { %2458 = vmatprep.subr.bf16.mxu0 %v2851_v0  ;;  %v1624_v24 = vsel %vm1484_vm5, %v1237_v19, 0 }
 0x352   : > { %v1279_v38 = vpop.f32.mrb[0].mxu1 }
 0x353   : > { %v1429_v39 = vsel %vm1428_vm6, -10000.0, %v1279_v38  ;;  %v2420_v40 = vpop.f32.mrb[1].mxu1 }
 0x354   : > { %v1282_v41 = vpop.f32.mrb[2].mxu1  ;;  %v1325_v42 = vpop.f32.mrb[4].mxu0  ;;  %v1433_v43 = vsel %vm1238_vm4, %v1429_v39, -inf }
 0x355   : > { %v1430_v44 = vsel %vm1428_vm6, -10000.0, %v1325_v42  ;;  %1434 = vmax.xlane.f32.xlu0 %v1433_v43  ;;  %v2421_v45 = vpop.f32.mrb[3].mxu1  ;;  %v2426_v46 = vpop.f32.mrb[5].mxu0 }
 0x356   : > { %v1328_v47 = vpop.f32.mrb[6].mxu0  ;;  %v1436_v48 = vsel %vm1238_vm4, %v1430_v44, -inf }
 0x357   : > { %1437 = vmax.xlane.f32.xlu1 %v1436_v48  ;;  %v2427_v49 = vpop.f32.mrb[7].mxu0 }
 0x35a   : > { %v1371_v50 = vpop.f32.mrb[4].mxu1 }
 0x35b   : > { %v1431_v51 = vsel %vm1428_vm6, -10000.0, %v1371_v50  ;;  %v2432_v52 = vpop.f32.mrb[5].mxu1 }
 0x35c   : > { %v1374_v53 = vpop.f32.mrb[6].mxu1  ;;  %v1417_v54 = vpop.f32.mrb[8].mxu0  ;;  %v1439_v55 = vsel %vm1238_vm4, %v1431_v51, -inf }
 0x35d   : > { %v1432_v56 = vsel %vm1428_vm6, -10000.0, %v1417_v54  ;;  %1440 = vmax.xlane.f32.xlu0 %v1439_v55  ;;  %v2433_v57 = vpop.f32.mrb[7].mxu1  ;;  %v2438_v58 = vpop.f32.mrb[9].mxu0 }
 0x35e   : > { %v1420_v59 = vpop.f32.mrb[10].mxu0  ;;  %v1442_v61 = vsel %vm1238_vm4, %v1432_v56, -inf }
 0x35f   : > { %v2439_v60 = vpop.f32.mrb[11].mxu0 }
 0x361   : > { %1443 = vmax.xlane.f32.xlu0 %v1442_v61 }
 0x3e2   : > { %v1435_v62 = vpop.xlane.xlu0 %1434 }
 0x3e3   : > { %v1445_v63 = vsub.f32 %v1429_v39, %v1435_v62 }
 0x3e4   : > { %v1438_v1 = vpop.xlane.xlu1 %1437 }
 0x3e5   : > { %v1449_v2 = vpack.c.bf16 %v1445_v63, %v1445_v63  ;;  %v1446_v4 = vsub.f32 %v1430_v44, %v1438_v1 }
 0x3e7   : > { %v1454_v6 = vmul.bf16 1069105081, %v1449_v2  ;;  %v1450_v7 = vpack.c.bf16 %v1446_v4, %v1446_v4 }
 0x3e9   : > { %2623 = vpow.bf16 %v1454_v6  ;;  %v1457_v8 = vmul.bf16 1069105081, %v1450_v7 }
 0x3ea   : > { %v1441_v9 = vpop.xlane.xlu0 %1440 }
 0x3eb   : > { %2625 = vpow.bf16 %v1457_v8  ;;  %v1447_v11 = vsub.f32 %v1431_v51, %v1441_v9 }
 0x3ed   : > { %v1451_v10 = vpack.c.bf16 %v1447_v11, %v1447_v11 }
 0x3ee   : > { %v1444_v12 = vpop.xlane.xlu0 %1443 }
 0x3ef   : > { %v1460_v13 = vmul.bf16 1069105081, %v1451_v10  ;;  %v1448_v14 = vsub.f32 %v1432_v56, %v1444_v12 }
 0x3f1   : > { %2627 = vpow.bf16 %v1460_v13  ;;  %v1452_v15 = vpack.c.bf16 %v1448_v14, %v1448_v14  ;;  %v2613_v13 = vld [vmem:[%s3437_s4] sm:$0xff]  }
 0x3f3   : > { %v1463_v17 = vmul.bf16 1069105081, %v1452_v15 }
 0x3f4   : > { %v2624_v18 = vpop.eup %2623 }
 0x3f5   : > { %2629 = vpow.bf16 %v1463_v17  ;;  %2443 = vmatmul.mubr.msk.bf16.vlgmr.msra.gmra.mrb[8].mxu1 %vm1238_vm4, %v2624_v18  ;;  %v1465_v22 = vunpack.c.l.bf16 %v2624_v18 }
 0x3f6   : > { %v2626_v23 = vpop.eup %2625  ;;  %2453 = vmatpush3.bf16.msra.mxu1 %v1578_v20  ;;  %2454 = vmatprep.mubr.msk.bf16.mxu1 %vm2852_vm0, %v2851_v0 }
 0x3f7   : > { %2449 = vmatmul.mubr.msk.bf16.vlgmr.msra.gmra.mrb[12].mxu0 %vm1238_vm4, %v2626_v23  ;;  %v1469_v26 = vsel %vm1238_vm4, %v1465_v22, 0.0  ;;  %v1466_v27 = vunpack.c.l.bf16 %v2626_v23  ;;  %2464 = vmatprep.subr.bf16.mxu1 %v2851_v0  ;;  %v2614_v23 = vld [vmem:[%s3437_s4 + $0x8] sm:$0xff]  }
 0x3f8   : > { %2459 = vmatpush3.bf16.msra.mxu0 %v1624_v24  ;;  %1470 = vadd.xlane.f32.xlu1 %v1469_v26 }
 0x3f9   : > { %v1472_v28 = vsel %vm1238_vm4, %v1466_v27, 0.0  ;;  %2460 = vmatprep.mubr.msk.bf16.mxu0 %vm2852_vm0, %v2851_v0  ;;  %2472 = vmatprep.subr.bf16.mxu0 %v2851_v0 }
 0x3fa   : > { %1473 = vadd.xlane.f32.xlu0 %v1472_v28 }
 0x3fc   : > { %v2628_v29 = vpop.eup %2627 }
 0x3fd   : > { %2455 = vmatmul.mubr.msk.bf16.vlgmr.msra.gmra.mrb[12].mxu1 %vm1238_vm4, %v2628_v29  ;;  %v1467_v30 = vunpack.c.l.bf16 %v2628_v29 }
 0x3fe   : > { %2468 = vmatprep.mubr.msk.bf16.mxu1 %vm2852_vm0, %v2851_v0  ;;  %2465 = vmatpush3.bf16.msra.mxu1 %v2613_v13 }
 0x3ff   : > { %v1475_v31 = vsel %vm1238_vm4, %v1467_v30, 0.0  ;;  %2466 = vmatprep.subr.bf16.mxu1 %v2851_v0 }
 0x400   : > { %v2630_v32 = vpop.eup %2629  ;;  %1476 = vadd.xlane.f32.xlu1 %v1475_v31 }
 0x401   : > { %2461 = vmatmul.mubr.msk.bf16.vlgmr.msra.gmra.mrb[16].mxu0 %vm1238_vm4, %v2630_v32  ;;  %v1468_v33 = vunpack.c.l.bf16 %v2630_v32 }
 0x402   : > { %2476 = vmatprep.mubr.msk.bf16.mxu0 %vm2852_vm0, %v2851_v0  ;;  %2467 = vmatpush3.bf16.msra.mxu1 %v2614_v23 }
 0x403   : > { %v1478_v5 = vsel %vm1238_vm4, %v1468_v33, 0.0  ;;  %2480 = vmatprep.subr.bf16.mxu1 %v2851_v0 }
 0x404   : > { %1479 = vadd.xlane.f32.xlu0 %v1478_v5 }
 0x485   : > { %v1471_v34 = vpop.xlane.xlu1 %1470 }
 0x486   : > { %2631 = vrcp.f32 %v1471_v34 }
 0x487   : > { %v1474_v35 = vpop.xlane.xlu0 %1473 }
 0x48d   : > { %v1477_v36 = vpop.xlane.xlu1 %1476 }
 0x48e   : > { %2633 = vrcp.f32 %v1477_v36 }
 0x48f   : > { %2635 = vrcp.f32 %v1474_v35 }
 0x490   : > { %v2632_v46 = vpop.eup %2631 }
 0x491   : > { %v1480_v37 = vpop.xlane.xlu0 %1479 }
 0x492   : > { %2637 = vrcp.f32 %v1480_v37 }
 0x498   : > { %v2634_v47 = vpop.eup %2633 }
 0x499   : > { %v2636_v53 = vpop.eup %2635 }
 0x49c   : > { %v2638_v57 = vpop.eup %2637 }
 0x4c8   : > { %v1522_v38 = vpop.f32.mrb[8].mxu1 }
 0x4c9   : > { %v2444_v39 = vpop.f32.mrb[9].mxu1  ;;  %v1670_v49 = vmul.f32 %v2632_v46, %v1522_v38 }
 0x4ca   : > { %v1525_v40 = vpop.f32.mrb[10].mxu1  ;;  %v1568_v41 = vpop.f32.mrb[12].mxu0 }
 0x4cb   : > { %v2445_v42 = vpop.f32.mrb[11].mxu1  ;;  %v2450_v43 = vpop.f32.mrb[13].mxu0  ;;  %v1671_v59 = vmul.f32 %v2636_v53, %v1568_v41 }
 0x4cc   : > { %v1571_v44 = vpop.f32.mrb[14].mxu0 }
 0x4cd   : > { %v2451_v45 = vpop.f32.mrb[15].mxu0 }
 0x4ce   : > { %v2349_v45 = vld [vmem:[#allocation8] ss:$0 sm:$0xff] }
 0x4d0   : > { %v1614_v48 = vpop.f32.mrb[12].mxu1 }
 0x4d1   : > { %v1672_v50 = vmul.f32 %v2634_v47, %v1614_v48  ;;  %v2456_v51 = vpop.f32.mrb[13].mxu1 }
 0x4d2   : > { %v1617_v52 = vpop.f32.mrb[14].mxu1 }
 0x4d3   : > { %v1674_v54 = vcombine.low %v1670_v49, %v1672_v50  ;;  %v1675_v55 = vcombine.high %v1670_v49, %v1672_v50  ;;  %v2457_v56 = vpop.f32.mrb[15].mxu1 }
 0x4d4   : > { %v1660_v58 = vpop.f32.mrb[16].mxu0 }
 0x4d5   : > { %v1673_v60 = vmul.f32 %v2638_v57, %v1660_v58  ;;  %v2462_v61 = vpop.f32.mrb[17].mxu0  ;;  %v1682_v4 = vrot.slane %v1674_v54, %v3159_v21  ;;  %v1689_v6 = vrot.slane %v1675_v55, %v3159_v21  ;;  %v2615_v58 = vld [vmem:[%s3441_s8] sm:$0xff]  }
 0x4d6   : > { %v1663_v62 = vpop.f32.mrb[18].mxu0  ;;  %2473 = vmatpush3.bf16.msra.mxu0 %v2615_v58 }
 0x4d7   : > { %v1690_v63 = vcombine.low %v1671_v59, %v1673_v60  ;;  %v1691_v1 = vcombine.high %v1671_v59, %v1673_v60  ;;  %v2463_v2 = vpop.f32.mrb[19].mxu0  ;;  %v2616_v59 = vld [vmem:[%s3441_s8 + $0x8] sm:$0xff]   ;;  %2474 = vmatprep.subr.bf16.mxu0 %v2851_v0 }
 0x4d8   : > { %v2618_v60 = vld [vmem:[%s3443_s10 + $0x8] sm:$0xff]   ;;  %v2353_v2 = vld [vmem:[#allocation10] ss:$0 sm:$0xff] }
 0x4d9   : > { %v1698_v7 = vrot.slane %v1690_v63, %v3159_v21  ;;  %v1705_v8 = vrot.slane %v1691_v1, %v3159_v21 }
 0x4da   : > { %2475 = vmatpush3.bf16.msra.mxu0 %v2616_v59 }
 0x4db   : > { %v1706_v9 = vcombine.low %v1682_v4, %v1698_v7  ;;  %v1707_v11 = vcombine.high %v1682_v4, %v1698_v7  ;;  %v1722_v10 = vcombine.low %v1689_v6, %v1705_v8  ;;  %v1723_v12 = vcombine.high %v1689_v6, %v1705_v8  ;;  %2492 = vmatprep.subr.bf16.mxu0 %v2851_v0  ;;  %v2354_v6 = vld [vmem:[#allocation11] ss:$0 sm:$0xff] }
 0x4dd   : > { %v1714_v14 = vrot.slane %v1706_v9, %v3162_v25  ;;  %v1721_v15 = vrot.slane %v1707_v11, %v3162_v25  ;;  %v1730_v16 = vrot.slane %v1722_v10, %v3162_v25  ;;  %v1737_v17 = vrot.slane %v1723_v12, %v3162_v25  ;;  %v2619_v11 = vld [vmem:[%s3443_s10 + $0x10] sm:$0xff]   ;;  %v2620_v10 = vld [vmem:[%s3443_s10 + $0x18] sm:$0xff]   ;;  %v2355_v12 = vld [vmem:[%s3442_s9] ss:$0 sm:$0xff] }
 0x4df   : > { %v1742_v18 = vcombine.low %v1714_v14, %v1721_v15  ;;  %v2347_v19 = vcombine.high %v1714_v14, %v1721_v15  ;;  %v1758_v20 = vcombine.low %v1730_v16, %v1737_v17  ;;  %v2348_v22 = vcombine.high %v1730_v16, %v1737_v17 }
 0x4e1   : > { %v1749_v24 = vrot.slane %v1742_v18, %v3159_v21  ;;  %v1757_v26 = vrot.slane %v2347_v19, %v3159_v21  ;;  %v1765_v27 = vrot.slane %v1758_v20, %v3159_v21  ;;  %v1773_v28 = vrot.slane %v2348_v22, %v3159_v21  ;;  %v2359_v20 = vld [vmem:[%s3444_s11] ss:$0 sm:$0xff] }
 0x4e3   : > { %v1775_v29 = vcombine.high %v1749_v24, %v1757_v26  ;;  %v1791_v30 = vcombine.high %v1765_v27, %v1773_v28  ;;  %v1774_v31 = vcombine.low %v1749_v24, %v1757_v26  ;;  %v1790_v32 = vcombine.low %v1765_v27, %v1773_v28 }
 0x4e5   : > { %v1789_v33 = vrot.slane %v1775_v29, %v3162_v25  ;;  %v1805_v5 = vrot.slane %v1791_v30, %v3162_v25  ;;  %v1782_v34 = vrot.slane %v1774_v31, %v3162_v25  ;;  %v1798_v35 = vrot.slane %v1790_v32, %v3162_v25 }
 0x4e7   : > { %v1808_v36 = vcombine.low %v1789_v33, %v1805_v5  ;;  %v1807_v37 = vcombine.high %v1782_v34, %v1798_v35  ;;  %v1809_v38 = vcombine.high %v1789_v33, %v1805_v5  ;;  %v1806_v39 = vcombine.low %v1782_v34, %v1798_v35  ;;  %v2621_v34 = vld [vmem:[%s3447_s14] sm:$0xff]   ;;  %v2622_v35 = vld [vmem:[%s3447_s14 + $0x8] sm:$0xff]  }
 0x4e9   : > { %1815 = vrot.lane.b32.xlu0 %v1808_v36, %s2861_s27  ;;  %1811 = vrot.lane.b32.xlu1 %v1807_v37, %s2862_s13  ;;  %s2372_s27 = sshll.u32 %s2837_s24, 7  ;;  %s598_s13 = scalar_lea.vmem [#allocation13], %s2332_s29 }
 0x4ea   : > { %s3386_s15 = scalar_lea.hbm %s3490_s17, %s2372_s27 }
 0x4ed   : > { %1819 = vrot.lane.b32.xlu1 %v1809_v38, %s2863_s23  ;;  %s2191_s23 = sshll.u32 %s598_s13, 4  ;;  %s3388_s23 = int_to_ptr.vmem [resolvable:$true] %s2191_s23 }
 0x4ee   : > { %s2755_s24 = scalar_lea.vmem %s3388_s23, 128  ;;  %p2762_p11 = scmp.lt.s32.totalorder %s3388_s23, %s2760_s16 }
 0x4ef   : > { %p2756_p1 = scmp.ne.s32.totalorder %s3388_s23, %s2755_s24 }
 0x4f1   : > { %p2757_p8 = pnand %p2756_p1, %p3491_p4 }
 0x4f3   : > { %p2758_p10 = pneg %p2757_p8 }
 0x55b   : > { %v1812_v21 = vpop.permute.xlu1 %1811  ;;  %v1816_v40 = vpop.permute.xlu0 %1815 }
 0x55c   : > { %v1822_v41 = vsel %vm1238_vm4, %v1806_v39, %v1812_v21  ;;  %v2365_v21 = vld [vmem:[%s3445_s12] ss:$0 sm:$0xff] }
 0x55d   : > { %v1824_v43 = vsel %vm1823_vm7, %v1822_v41, %v1816_v40  ;;  %v2366_v41 = vld [vmem:[%s3487_s18] ss:$0 sm:$0xff]  ;;  %s2761_s18 = scalar_lea.vmem %s2760_s16, 256 }
 0x55e   : > { %p2763_p3 = scmp.lt.s32.totalorder %s2761_s18, %s2755_s24 }
 0x55f   : > { %v1820_v42 = vpop.permute.xlu1 %1819 }
 0x560   : > { %v1826_v44 = vsel %vm1825_vm8, %v1824_v43, %v1820_v42  ;;  %p2764_p5 = por %p2763_p3, %p2762_p11 }
 0x561   : > { %v1827_v25 = vpack.c.bf16 %v1826_v44, %v1826_v44 }
 0x562   : > { %p2765_p6 = pnand %p2764_p5, %p2758_p10 }
 0x563   : > { %2469 = vmatmul.mubr.msk.bf16.vlgmr.msra.gmra.mrb[16].mxu1 %vm640_vm1, %v1827_v25 }
 0x564   : > { %2488 = vmatprep.mubr.msk.bf16.mxu1 %vm2852_vm0, %v2851_v0 }
 0x636   : > { %v1889_v46 = vpop.f32.mrb[16].mxu1 }
 0x637   : > { %v1890_v47 = vadd.f32 %v2349_v45, %v1889_v46  ;;  %v2470_v48 = vpop.f32.mrb[17].mxu1 }
 0x638   : > { %v1892_v49 = vpop.f32.mrb[18].mxu1 }
 0x639   : > { %v2471_v50 = vpop.f32.mrb[19].mxu1  ;;  %v1895_v51 = vadd.f32 %v1890_v47, %v3143_v3  ;;  %v2617_v3 = vld [vmem:[%s3443_s10] sm:$0xff]  }
 0x63a   : > { %2481 = vmatpush3.bf16.msra.mxu1 %v2617_v3 }
 0x63b   : > { %v1898_v52 = vsel %vm640_vm1, %v1895_v51, 0.0  ;;  %2482 = vmatprep.subr.bf16.mxu1 %v2851_v0 }
 0x63c   : > { %1899 = vadd.xlane.f32.xlu1 %v1898_v52 }
 0x63e   : > { %2483 = vmatpush3.bf16.msra.mxu1 %v2618_v60 }
 0x63f   : > { %2484 = vmatprep.subr.bf16.mxu1 %v2851_v0 }
 0x642   : > { %2485 = vmatpush3.bf16.msra.mxu1 %v2619_v11 }
 0x643   : > { %2486 = vmatprep.subr.bf16.mxu1 %v2851_v0 }
 0x646   : > { %2487 = vmatpush3.bf16.msra.mxu1 %v2620_v10 }
 0x6c9   : > { %v1900_v53 = vpop.xlane.xlu1 %1899 }
 0x6ca   : > { %v1902_v54 = vmul.f32 0.03125, %v1900_v53 }
 0x6cc   : > { %v1903_v55 = vsub.f32 %v1895_v51, %v1902_v54 }
 0x6ce   : > { %v1904_v56 = vmul.f32 %v1903_v55, %v1903_v55 }
 0x6d0   : > { %v1905_v57 = vsel %vm640_vm1, %v1904_v56, 0.0 }
 0x6d1   : > { %1906 = vadd.xlane.f32.xlu0 %v1905_v57 }
 0x75e   : > { %v1907_v61 = vpop.xlane.xlu0 %1906 }
 0x75f   : > { %v1908_v62 = vmul.f32 0.03125, %v1907_v61 }
 0x761   : > { %v1909_v63 = vadd.f32 1e-12, %v1908_v62 }
 0x763   : > { %2639 = vrsqrt.f32 %v1909_v63 }
 0x76d   : > { %v2640_v1 = vpop.eup %2639 }
 0x76e   : > { %v1911_v4 = vmul.f32 %v2640_v1, %v1903_v55 }
 0x770   : > { %v1918_v7 = vmul.f32 %v2353_v2, %v1911_v4 }
 0x772   : > { %v1925_v8 = vadd.f32 %v2354_v6, %v1918_v7 }
 0x774   : > { %v1926_v9 = vpack.c.bf16 %v1925_v8, %v1925_v8 }
 0x776   : > { %2477 = vmatmul.mubr.msk.bf16.vlgmr.msra.gmra.mrb[20].mxu0 %vm640_vm1, %v1926_v9 }
 0x777   : > { %2496 = vmatprep.mubr.msk.bf16.mxu0 %vm2852_vm0, %v2851_v0  ;;  %2493 = vmatpush3.bf16.msra.mxu0 %v2621_v34 }
 0x778   : > { %2494 = vmatprep.subr.bf16.mxu0 %v2851_v0  ;;  %v2367_v0 = vld [vmem:[%s3488_s28] ss:$0 sm:$0xff] }
 0x77b   : > { %2495 = vmatpush3.bf16.msra.mxu0 %v2622_v35 }
 0x849   : > { %v1987_v13 = vpop.f32.mrb[20].mxu0 }
 0x84a   : > { %v1988_v14 = vadd.f32 %v2355_v12, %v1987_v13  ;;  %v2478_v15 = vpop.f32.mrb[21].mxu0 }
 0x84b   : > { %v1990_v16 = vpop.f32.mrb[22].mxu0 }
 0x84c   : > { %v1993_v17 = vmax.f32 %v1988_v14, 0.0  ;;  %v2479_v18 = vpop.f32.mrb[23].mxu0 }
 0x84e   : > { %v1994_v19 = vpack.c.bf16 %v1993_v17, %v1993_v17 }
 0x850   : > { %2489 = vmatmul.mubr.msk.bf16.vlgmr.msra.gmra.mrb[20].mxu1 %vm2034_vm9, %v1994_v19 }
 0x923   : > { %v2072_v22 = vpop.f32.mrb[20].mxu1 }
 0x924   : > { %v2073_v23 = vadd.f32 %v2359_v20, %v2072_v22  ;;  %v2490_v24 = vpop.f32.mrb[21].mxu1 }
 0x925   : > { %v2075_v26 = vpop.f32.mrb[22].mxu1 }
 0x926   : > { %v2491_v27 = vpop.f32.mrb[23].mxu1  ;;  %v2078_v28 = vadd.f32 %v2073_v23, %v1925_v8 }
 0x928   : > { %v2081_v29 = vsel %vm640_vm1, %v2078_v28, 0.0 }
 0x929   : > { %2082 = vadd.xlane.f32.xlu0 %v2081_v29 }
 0x9b6   : > { %v2083_v30 = vpop.xlane.xlu0 %2082 }
 0x9b7   : > { %v2084_v31 = vmul.f32 0.03125, %v2083_v30 }
 0x9b9   : > { %v2085_v32 = vsub.f32 %v2078_v28, %v2084_v31 }
 0x9bb   : > { %v2086_v33 = vmul.f32 %v2085_v32, %v2085_v32 }
 0x9bd   : > { %v2087_v5 = vsel %vm640_vm1, %v2086_v33, 0.0 }
 0x9be   : > { %2088 = vadd.xlane.f32.xlu1 %v2087_v5 }
 0xa4b   : > { %v2089_v36 = vpop.xlane.xlu1 %2088 }
 0xa4c   : > { %v2090_v37 = vmul.f32 0.03125, %v2089_v36 }
 0xa4e   : > { %v2091_v38 = vadd.f32 1e-12, %v2090_v37 }
 0xa50   : > { %2641 = vrsqrt.f32 %v2091_v38 }
 0xa5a   : > { %v2642_v39 = vpop.eup %2641 }
 0xa5b   : > { %v2093_v40 = vmul.f32 %v2642_v39, %v2085_v32 }
 0xa5d   : > { %v2100_v42 = vmul.f32 %v2365_v21, %v2093_v40 }
 0xa5f   : > { %v2107_v43 = vadd.f32 %v2366_v41, %v2100_v42 }
 0xa61   : > { %v2108_v44 = vpack.c.bf16 %v2107_v43, %v2107_v43 }
 0xa63   : > { %2497 = vmatmul.mubr.msk.bf16.vlgmr.msra.gmra.mrb[24].mxu0 %vm640_vm1, %v2108_v44 }
 0xb36   : > { %v2169_v25 = vpop.f32.mrb[24].mxu0 }
 0xb37   : > { %v2170_v45 = vadd.f32 %v2367_v0, %v2169_v25  ;;  %v2498_v46 = vpop.f32.mrb[25].mxu0 }
 0xb38   : > { %v2172_v47 = vpop.f32.mrb[26].mxu0 }
 0xb39   : > { %2175 = vst [vmem:[%s598_s13] sm:$0xff] %v2170_v45  ;;  %v2499_v48 = vpop.f32.mrb[27].mxu0 }
 0xb3a   : > { %2768 = shalt.err (!%p2765_p6)
}
 0xb3b   : > { %s2769_s5 = scalar_lea.hbm %s3386_s15, 128  ;;  %s2773_s20 = scalar_lea.hbm %s3490_s17, 256 }
 0xb3c   : > { %p2770_p7 = scmp.ne.s32.totalorder %s3386_s15, %s2769_s5  ;;  %p2774_p0 = scmp.lt.u32.totalorder %s3386_s15, %s3490_s17 }
 0xb3d   : > { %p2775_p2 = scmp.lt.u32.totalorder %s2773_s20, %s2769_s5  ;;  %p2777_p1 = scmp.lt.u32.totalorder %s2769_s5, %s3386_s15 }
 0xb3e   : > { %p2771_p9 = pnand %p2770_p7, %p3491_p4 }
 0xb3f   : > { %p2776_p13 = por %p2775_p2, %p2774_p0 }
 0xb40   : > { %p2772_p12 = pneg %p2771_p9 }
 0xb41   : > { %p2778_p8 = por %p2777_p1, %p2776_p13 }
 0xb43   : > { %p2779_p10 = pnand %p2778_p8, %p2772_p12 }
 0xb45   : > { %2782 = shalt.err (!%p2779_p10)
}
 0xb46   : > { %2516 = dma.vmem_to_hbm [thread:$0]  (%p3491_p4), %s3388_s23, 128, %s3386_s15, %s2177_s0  }
 0xb47 PF: > { %s3492_s13 = sld [smem:[#allocation21_spill]]  ;;  %s3493_s19 = sld [smem:[#allocation18_spill]] }
 0xb48   : > { %s3494_s26 = sld [smem:[#allocation24_spill]] }
 0xb4d   : > { %p2543_p11 = scmp.ge.s32.totalorder %s3492_s13, 2  ;;  %s2203_s24 = sand.u32 1, %s3493_s19  }
 0xb4e   : > { %p3495_p3 = scmp.ne.s32.totalorder %s3494_s26, 0  ;;  %s2204_s25 = scalar_lea.sflag [#allocation7], %s2203_s24 }
 0xb50   : > { %p2532_p5 = pnand %p2543_p11, %p3495_p3 }
 0xb52   : > { %2820 = dma.done.wait (!%p2532_p5), %s2204_s25, 128  }
 0xb53   : > { %2822 = vsyncadd (!%p2532_p5), %s2204_s25, 4294967168  ;;  %s32_s26 = sadd.s32 1, %s3492_s13   ;;  %s3496_s16 = sld [smem:[#allocation19_spill]] }
 0xb54   : > { %p29_p6 = scmp.ge.s32.totalorder %s32_s26, 4   ;;  %s3497_s23 = sld [smem:[#allocation25_spill]] }
 0xb55   : > { %s3498_s24 = sld [smem:[#allocation20_spill]]  ;;  %s3499_s25 = sld [smem:[#allocation22_spill]] }
 0xb56   : > { %s3500_s21 = smov %s2829_s22  ;;  %31 = sbr.rel (!%p29_p6) target bundleno = 13 (0xd), region = 145 }
 0xb59   : > { %s3501_s22 = smov %s3496_s16 }
 0xb5d   :  { %2209 = vsyncpa [#allocation6], 1 }
 0xb5e   :  { %2211 = vsyncpa [#allocation6 + $0x1], 1 }
 0xb5f   :  { %2212 = vsyncpa [#allocation9], 1 }
 0xb60   :  { %2213 = vsyncpa [#allocation12], 1 }
 0xb61   :  { %2214 = vsyncpa [#allocation7], 1 }
 0xb62   :  { %2216 = vsyncpa [#allocation7 + $0x1], 1 }

</bundles_post_ra>
